<compile_context>
chip_gen: v7x
topology: tpu7x:2x2x1
jax: 0.10.0
libtpu: 0.0.40
codegen_flags: <defaults>
</compile_context>

<pallas_src>
import functools

import jax
import jax.numpy as jnp
from jax.experimental import pallas as pl
from jax.experimental.pallas import tpu as pltpu


def _round_up(a, b):
    return (a + b - 1) // b * b


def _nonlocal_kernel(x_ref, wtpg_ref, btpg_ref, ww_ref, bw_ref, o_ref, *, z, ci):
    """One row block: (row_block*Z, C) slab -> projections -> attention -> out."""
    # Fused theta/phi/g projection: one big 2-D MXU matmul, f32 accumulation.
    # (1/N is already folded into the theta columns of wtpg.)
    tpg = jnp.dot(x_ref[...], wtpg_ref[...],
                  preferred_element_type=jnp.float32) + btpg_ref[...]
    mbz = tpg.shape[0]
    mb = mbz // z
    tpg3 = tpg.reshape(mb, z, 3 * ci)
    theta = tpg3[:, :, :ci]                 # (Mb, Z, Ci), pre-scaled by 1/N
    pg = tpg3[:, :, ci:]                    # (Mb, Z, 2*Ci) = [phi | g]

    # MaxPool3d((1,1,2)) over Z: group adjacent pairs and reduce
    # (no stride-2 sublane gathers).
    pg_p = jnp.max(pg.reshape(mb, z // 2, 2, 2 * ci), axis=2)   # (Mb, Z/2, 2Ci)
    phi_p = pg_p[:, :, :ci]
    g_p = pg_p[:, :, ci:]

    # Per-(b,w,h)-row attention over the Z axis (batched small matmuls).
    # NOTE: with large row_block and tiny Z/Ci these under-fill the MXU; a
    # lane-packed VPU formulation is a possible follow-up once profiled.
    f = jnp.einsum('mzi,mki->mzk', theta, phi_p,
                   preferred_element_type=jnp.float32)          # (Mb, Z, Z/2)
    y = jnp.einsum('mzk,mki->mzi', f, g_p,
                   preferred_element_type=jnp.float32)          # (Mb, Z, Ci)

    # Output projection with eval-mode BatchNorm folded into weight/bias.
    wy = jnp.dot(y.reshape(mbz, ci).astype(ww_ref.dtype), ww_ref[...],
                 preferred_element_type=jnp.float32) + bw_ref[...]

    # Residual (re-read x_ref so the input value need not stay live above).
    o_ref[...] = (wy + x_ref[...].astype(jnp.float32)).astype(o_ref.dtype)


def nonlocal_block2(x, params, *, row_block=512):
    """x: (B, C, W, H, Z) float32/bf16 (PyTorch Conv3d NCDHW-style layout)."""
    B, C, W, H, Z = x.shape
    Ci = params['w_theta'].shape[1]
    assert Z % 2 == 0, "sub_sample=True requires an even last dimension"
    M = B * W * H
    n_pool = Z // 2
    eps = 1e-5

    # ---- fold constants into the weights (once, outside the kernel) --------
    # 1/N into theta; eval-mode BatchNorm affine into the W conv.
    w_tpg = jnp.concatenate(
        [params['w_theta'] / n_pool, params['w_phi'], params['w_g']], axis=1)
    b_tpg = jnp.concatenate(
        [params['b_theta'] / n_pool, params['b_phi'], params['b_g']]
    ).reshape(1, 3 * Ci)
    bn_scale = params['bn_gamma'] / jnp.sqrt(params['bn_var'] + eps)
    bn_shift = params['bn_beta'] - params['bn_mean'] * bn_scale
    w_w_eff = params['w_w'] * bn_scale[None, :]
    b_w_eff = (params['b_w'] * bn_scale + bn_shift).reshape(1, C)
    # TODO(synk): train-mode BatchNorm batch-statistics tracking is not ported;
    # only the eval-mode affine transform is folded in here.

    # Matmul operands in the activation dtype (bf16 in -> bf16 MXU passes,
    # f32 accumulation); biases stay f32.
    w_tpg = w_tpg.astype(x.dtype)
    w_w_eff = w_w_eff.astype(x.dtype)
    b_tpg = b_tpg.astype(jnp.float32)
    b_w_eff = b_w_eff.astype(jnp.float32)

    # ---- tiling over the M = B*W*H row axis --------------------------------
    # This kernel is memory bound: use large row blocks, clamped to keep >= 2
    # grid steps (pipelining / cross-TC sharding) and 8-sublane-friendly block
    # shapes; the tail is zero padded instead of asserting divisibility.
    row_block = max(8, min(int(row_block), _round_up(M, 16) // 2))
    row_block = _round_up(row_block, 8)
    M_pad = _round_up(M, row_block)
    grid = M_pad // row_block

    x_rows = jnp.transpose(x, (0, 2, 3, 4, 1)).reshape(M, Z, C)
    if M_pad != M:
        x_rows = jnp.concatenate(
            [x_rows, jnp.zeros((M_pad - M, Z, C), x.dtype)], axis=0)
    x2d = x_rows.reshape(M_pad * Z, C)

    kernel = functools.partial(_nonlocal_kernel, z=Z, ci=Ci)

    out2d = pl.pallas_call(
        kernel,
        out_shape=jax.ShapeDtypeStruct((M_pad * Z, C), x.dtype),
        grid=(grid,),
        in_specs=[
            pl.BlockSpec((row_block * Z, C), lambda i: (i, 0)),   # x slab
            pl.BlockSpec((C, 3 * Ci), lambda i: (0, 0)),          # fused theta/phi/g
            pl.BlockSpec((1, 3 * Ci), lambda i: (0, 0)),
            pl.BlockSpec((Ci, C), lambda i: (0, 0)),              # W conv (+BN)
            pl.BlockSpec((1, C), lambda i: (0, 0)),
        ],
        out_specs=pl.BlockSpec((row_block * Z, C), lambda i: (i, 0)),
        compiler_params=pltpu.CompilerParams(
            dimension_semantics=("parallel",)),
    )(x2d, w_tpg, b_tpg, w_w_eff, b_w_eff)

    out_rows = out2d.reshape(M_pad, Z, C)[:M]
    return out_rows.reshape(B, W, H, Z, C).transpose(0, 4, 1, 2, 3)


def ref_forward(x, params):
    """Pure-JAX reference mirroring the PyTorch forward (no folding)."""
    B, C, W, H, Z = x.shape
    eps = 1e-5
    with jax.default_matmul_precision('highest'):
        xl = jnp.transpose(x, (0, 2, 3, 4, 1)).reshape(-1, Z, C).astype(jnp.float32)
        theta = xl @ params['w_theta'] + params['b_theta']
        phi = xl @ params['w_phi'] + params['b_phi']
        g = xl @ params['w_g'] + params['b_g']
        phi_p = jnp.maximum(phi[:, 0::2, :], phi[:, 1::2, :])
        g_p = jnp.maximum(g[:, 0::2, :], g[:, 1::2, :])
        f = jnp.einsum('mzi,mki->mzk', theta, phi_p) / (Z // 2)
        y = jnp.einsum('mzk,mki->mzi', f, g_p)
        wy = jnp.einsum('mzi,io->mzo', y, params['w_w']) + params['b_w']
        scale = params['bn_gamma'] / jnp.sqrt(params['bn_var'] + eps)
        shift = params['bn_beta'] - params['bn_mean'] * scale
        wy = wy * scale + shift
        out = (wy + xl).reshape(B, W, H, Z, C).transpose(0, 4, 1, 2, 3)
    return out.astype(x.dtype)


def init_params(key, C, Ci):
    """Synthetic parameters matching the module's shapes.

    PyTorch Conv3d weights are (out, in, 1, 1, 1); stored transposed here as
    (in, out) so the kernel right-multiplies channels-last activations.
    BN weight/bias default to 0 exactly as in the module's __init__.
    """
    ks = jax.random.split(key, 8)
    scale = 0.1
    return {
        'w_theta': scale * jax.random.normal(ks[0], (C, Ci), jnp.float32),
        'b_theta': scale * jax.random.normal(ks[1], (Ci,), jnp.float32),
        'w_phi': scale * jax.random.normal(ks[2], (C, Ci), jnp.float32),
        'b_phi': scale * jax.random.normal(ks[3], (Ci,), jnp.float32),
        'w_g': scale * jax.random.normal(ks[4], (C, Ci), jnp.float32),
        'b_g': scale * jax.random.normal(ks[5], (Ci,), jnp.float32),
        'w_w': scale * jax.random.normal(ks[6], (Ci, C), jnp.float32),
        'b_w': scale * jax.random.normal(ks[7], (C,), jnp.float32),
        'bn_gamma': jnp.zeros((C,), jnp.float32),   # nn.init.constant(..., 0)
        'bn_beta': jnp.zeros((C,), jnp.float32),    # nn.init.constant(..., 0)
        'bn_mean': jnp.zeros((C,), jnp.float32),    # fresh running_mean
        'bn_var': jnp.ones((C,), jnp.float32),      # fresh running_var
    }


if __name__ == "__main__":
    key = jax.random.PRNGKey(0)
    k_x, k_p = jax.random.split(key)

    # Small 5-D input (B, C, W, H, Z); M = B*W*H = 40 also exercises the
    # padded-tail path of the row tiling.
    B, C, W, H, Z = 2, 8, 5, 4, 8
    Ci = C // 2                         # inter_channels = in_channels // 2
    x = jax.random.normal(k_x, (B, C, W, H, Z), jnp.float32)

    # 1) Module-init BatchNorm (gamma = beta = 0): out should equal x.
    params = init_params(k_p, C, Ci)
    out = jax.block_until_ready(nonlocal_block2(x, params))
    ref = ref_forward(x, params)
    assert out.shape == x.shape
    assert jnp.allclose(out, ref, atol=2e-3, rtol=2e-3), "mismatch (init BN)"

    # 2) Non-trivial BatchNorm so the attention/projection numerics are
    #    actually exercised (not zeroed out by gamma=0).
    params_bn = dict(params)
    params_bn['bn_gamma'] = 0.5 + 0.05 * jnp.arange(C, dtype=jnp.float32)
    params_bn['bn_beta'] = 0.05 * jnp.arange(C, dtype=jnp.float32) - 0.2
    params_bn['bn_mean'] = 0.02 * jnp.arange(C, dtype=jnp.float32)
    params_bn['bn_var'] = 1.0 + 0.1 * jnp.arange(C, dtype=jnp.float32)
    out_bn = jax.block_until_ready(nonlocal_block2(x, params_bn))
    ref_bn = ref_forward(x, params_bn)
    assert jnp.allclose(out_bn, ref_bn, atol=2e-3, rtol=2e-3), \
        "mismatch vs reference (nonzero BN)"

    print("KERNEL_OK")
</pallas_src>

<mosaic_0001>
module attributes {stable_mosaic.version = 11 : i64} {
  func.func @_nonlocal_kernel(%arg0: i32, %arg1: memref<192x8xf32, #tpu.memory_space<vmem>>, %arg2: memref<8x12xf32, #tpu.memory_space<vmem>>, %arg3: memref<1x12xf32, #tpu.memory_space<vmem>>, %arg4: memref<4x8xf32, #tpu.memory_space<vmem>>, %arg5: memref<1x8xf32, #tpu.memory_space<vmem>>, %arg6: memref<192x8xf32, #tpu.memory_space<vmem>>) attributes {dimension_semantics = [#tpu.dimension_semantics<parallel>], iteration_bounds = array<i64: 2>, scalar_prefetch = 0 : i64, scratch_operands = 0 : i64, tpu.core_type = #tpu.core_type<tc>, window_params = [{transform_indices = @transform_0, window_bounds = array<i64: 192, 8>}, {pipeline_mode = #tpu.pipeline_mode<synchronous>, transform_indices = @transform_1, window_bounds = array<i64: 8, 12>}, {pipeline_mode = #tpu.pipeline_mode<synchronous>, transform_indices = @transform_2, window_bounds = array<i64: 1, 12>}, {pipeline_mode = #tpu.pipeline_mode<synchronous>, transform_indices = @transform_3, window_bounds = array<i64: 4, 8>}, {pipeline_mode = #tpu.pipeline_mode<synchronous>, transform_indices = @transform_4, window_bounds = array<i64: 1, 8>}, {transform_indices = @transform_5, window_bounds = array<i64: 192, 8>}]} {
    %c0 = arith.constant 0 : index
    %c0_0 = arith.constant 0 : index
    %0 = vector.load %arg1[%c0, %c0_0] : memref<192x8xf32, #tpu.memory_space<vmem>>, vector<192x8xf32>
    %c0_1 = arith.constant 0 : index
    %c0_2 = arith.constant 0 : index
    %1 = vector.load %arg2[%c0_1, %c0_2] : memref<8x12xf32, #tpu.memory_space<vmem>>, vector<8x12xf32>
    %cst = arith.constant dense<0.000000e+00> : vector<192x12xf32>
    %2 = tpu.matmul %0, %1, %cst {dimension_numbers = #tpu.dot_dimension_numbers<[1], [0], [0], [1], [0, 0, 1, 1], [], []>} : vector<192x8xf32>, vector<8x12xf32>, vector<192x12xf32> -> vector<192x12xf32>
    %c0_3 = arith.constant 0 : index
    %c0_4 = arith.constant 0 : index
    %3 = vector.load %arg3[%c0_3, %c0_4] : memref<1x12xf32, #tpu.memory_space<vmem>>, vector<1x12xf32>
    %4 = vector.broadcast %3 : vector<1x12xf32> to vector<192x12xf32>
    %5 = arith.addf %2, %4 : vector<192x12xf32>
    %6 = vector.shape_cast %5 : vector<192x12xf32> to vector<24x8x12xf32>
    %7 = vector.extract_strided_slice %6 {offsets = [0, 0, 0], sizes = [24, 8, 4], strides = [1, 1, 1]} : vector<24x8x12xf32> to vector<24x8x4xf32>
    %8 = vector.extract_strided_slice %6 {offsets = [0, 0, 4], sizes = [24, 8, 8], strides = [1, 1, 1]} : vector<24x8x12xf32> to vector<24x8x8xf32>
    %9 = vector.shape_cast %8 : vector<24x8x8xf32> to vector<24x4x2x8xf32>
    %cst_5 = arith.constant dense<0xFF800000> : vector<24x4x8xf32>
    %10 = vector.multi_reduction <maximumf>, %9, %cst_5 [2] : vector<24x4x2x8xf32> to vector<24x4x8xf32>
    %11 = vector.extract_strided_slice %10 {offsets = [0, 0, 0], sizes = [24, 4, 4], strides = [1, 1, 1]} : vector<24x4x8xf32> to vector<24x4x4xf32>
    %12 = vector.extract_strided_slice %10 {offsets = [0, 0, 4], sizes = [24, 4, 4], strides = [1, 1, 1]} : vector<24x4x8xf32> to vector<24x4x4xf32>
    "tpu.trace_start"() <{level = 10 : i32, message = "mzi,mki->mzk"}> : () -> ()
    %cst_6 = arith.constant dense<0.000000e+00> : vector<24x8x4xf32>
    %13 = tpu.matmul %7, %11, %cst_6 {dimension_numbers = #tpu.dot_dimension_numbers<[2], [2], [1], [1], [0, 0, 0, 1, 1, 1], [0], [0]>} : vector<24x8x4xf32>, vector<24x4x4xf32>, vector<24x8x4xf32> -> vector<24x8x4xf32>
    "tpu.trace_stop"() : () -> ()
    "tpu.trace_start"() <{level = 10 : i32, message = "mzk,mki->mzi"}> : () -> ()
    %cst_7 = arith.constant dense<0.000000e+00> : vector<24x8x4xf32>
    %14 = tpu.matmul %13, %12, %cst_7 {dimension_numbers = #tpu.dot_dimension_numbers<[2], [1], [1], [2], [0, 0, 0, 1, 1, 2], [0], [0]>} : vector<24x8x4xf32>, vector<24x4x4xf32>, vector<24x8x4xf32> -> vector<24x8x4xf32>
    "tpu.trace_stop"() : () -> ()
    %15 = vector.shape_cast %14 : vector<24x8x4xf32> to vector<192x4xf32>
    %c0_8 = arith.constant 0 : index
    %c0_9 = arith.constant 0 : index
    %16 = vector.load %arg4[%c0_8, %c0_9] : memref<4x8xf32, #tpu.memory_space<vmem>>, vector<4x8xf32>
    %cst_10 = arith.constant dense<0.000000e+00> : vector<192x8xf32>
    %17 = tpu.matmul %15, %16, %cst_10 {dimension_numbers = #tpu.dot_dimension_numbers<[1], [0], [0], [1], [0, 0, 1, 1], [], []>} : vector<192x4xf32>, vector<4x8xf32>, vector<192x8xf32> -> vector<192x8xf32>
    %c0_11 = arith.constant 0 : index
    %c0_12 = arith.constant 0 : index
    %18 = vector.load %arg5[%c0_11, %c0_12] : memref<1x8xf32, #tpu.memory_space<vmem>>, vector<1x8xf32>
    %19 = vector.broadcast %18 : vector<1x8xf32> to vector<192x8xf32>
    %20 = arith.addf %17, %19 : vector<192x8xf32>
    %c0_13 = arith.constant 0 : index
    %c0_14 = arith.constant 0 : index
    %21 = vector.load %arg1[%c0_13, %c0_14] : memref<192x8xf32, #tpu.memory_space<vmem>>, vector<192x8xf32>
    %22 = arith.addf %20, %21 : vector<192x8xf32>
    %c0_15 = arith.constant 0 : index
    %c0_16 = arith.constant 0 : index
    %23 = vector.load %arg6[%c0_15, %c0_16] : memref<192x8xf32, #tpu.memory_space<vmem>>, vector<192x8xf32>
    tpu.vector_store %arg6[%c0_15, %c0_16], %22 {strides = array<i32>} : memref<192x8xf32, #tpu.memory_space<vmem>>, vector<192x8xf32>,
    return
  }
  func.func @transform_0(%arg0: i32) -> (i32, i32) {
    %c0_i32 = arith.constant 0 : i32
    %c0_i32_0 = arith.constant 0 : i32
    return %arg0, %c0_i32 : i32, i32
  }
  func.func @transform_1(%arg0: i32) -> (i32, i32) {
    %c0_i32 = arith.constant 0 : i32
    %c0_i32_0 = arith.constant 0 : i32
    %c0_i32_1 = arith.constant 0 : i32
    return %c0_i32, %c0_i32_0 : i32, i32
  }
  func.func @transform_2(%arg0: i32) -> (i32, i32) {
    %c0_i32 = arith.constant 0 : i32
    %c0_i32_0 = arith.constant 0 : i32
    %c0_i32_1 = arith.constant 0 : i32
    return %c0_i32, %c0_i32_0 : i32, i32
  }
  func.func @transform_3(%arg0: i32) -> (i32, i32) {
    %c0_i32 = arith.constant 0 : i32
    %c0_i32_0 = arith.constant 0 : i32
    %c0_i32_1 = arith.constant 0 : i32
    return %c0_i32, %c0_i32_0 : i32, i32
  }
  func.func @transform_4(%arg0: i32) -> (i32, i32) {
    %c0_i32 = arith.constant 0 : i32
    %c0_i32_0 = arith.constant 0 : i32
    %c0_i32_1 = arith.constant 0 : i32
    return %c0_i32, %c0_i32_0 : i32, i32
  }
  func.func @transform_5(%arg0: i32) -> (i32, i32) {
    %c0_i32 = arith.constant 0 : i32
    %c0_i32_0 = arith.constant 0 : i32
    return %arg0, %c0_i32 : i32, i32
  }
}

</mosaic_0001>

<bundles_post_ra>
// kernel: tpu_custom_call.1
= control target key start
LH: loop header
LB: loop body
LE: loop exit
PB: predicated region body
PF: predicated region fallthrough
CT: control target
= control target key end

     0   :  { %s6637_s18 = smov 0   ;;  %s8204_s0 = inlined_call_operand.vmem [shape: f32[384,8], index: 0, kind: input, shape index: {}]   ;;  %s8205_s1 = inlined_call_operand.vmem [shape: f32[8,12], index: 1, kind: input, shape index: {}]   ;;  %s8206_s2 = inlined_call_operand.vmem [shape: f32[1,12], index: 2, kind: input, shape index: {}]   ;;  %s8207_s3 = inlined_call_operand.vmem [shape: f32[4,8], index: 3, kind: input, shape index: {}]   ;;  %s8208_s4 = inlined_call_operand.vmem [shape: f32[1,8], index: 4, kind: input, shape index: {}]   ;;  %s8209_s5 = inlined_call_operand.vmem [shape: f32[384,8], index: 5, kind: output, shape index: {}]  }
   0x1 LB: > { %s5960_s19 = sadd.s32 4294967295, %s6600_s18   ;;  %p5964_p0 = scmp.ge.s32.totalorder %s6600_s18, 1  ;;  %s6600_s18 = sphi %s6637_s18, %s15_s18  }
   0x2   : > { %p188_p1 = scmp.lt.s32.totalorder %s6600_s18, 3 }
   0x4   : > { %p189_p2 = pnand %p5964_p0, %p188_p1 }
   0x6   : > { %192 = sbr.rel (%p189_p2) target bundleno = 1229 (0x4cd), region = 40 }
   0xd   : > { %v252_v0 = vld [vmem:[%s8205_s1] sm:$0xff]  ;;  %s216_s22 = smul.u32 24, %s5960_s19  ;;  %vm260_vm0 = vcmask 64512   ;;  %v6602_v25 = vmov 1983009808   ;;  %v546_v27 = vlaneseq  ;;  %vm1046_vm1 = vcmask 91168  }
   0xe   : > { %6262 = vmatprep.subr.mxu0 %v252_v0  ;;  %6578 = vmatprep.subr.mxu1 %v252_v0  ;;  %v544_v26 = vunpack.c.l.s4 %v6602_v25  ;;  %v6709_v30 = vld [vmem:[%s8206_s2] ss:$0 sm:$0xff]  ;;  %vm1723_vm2 = vcmask 1041409   ;;  %vm1725_vm3 = vcmask 1042434   ;;  %vm1727_vm4 = vcmask 1043459   ;;  %s6603_s29 = smov 124  }
   0xf   : > { %6263 = vmatpush3.msra.mxu0 %v252_v0  ;;  %p217_p3 = scmp.lt.s32.totalorder %s216_s22, 47  ;;  %6579 = vmatpush3.msra.mxu1 %v252_v0  ;;  %v547_v29 = vshrl.u32 %v546_v27, 7  ;;  %vm1731_vm5 = vcmask 31744   ;;  %vm6605_vm6 = vmmov 0   ;;  %s6606_s7 = smov 120   ;;  %vm3720_vm7 = vcmask 1043456  }
  0x10   : > { %v545_v28 = vunpack.c.0.s8 %v544_v26 }
  0x11   : > { %s8468_s22 = smov (!%p217_p3, %s216_s22), 47 }
  0x12   : > { %s5965_s23 = sshll.u32 %s8468_s22, 3  ;;  %v6711_v31 = vsub.s32 %v545_v28, %v547_v29 }
  0x13   : > { %s6656_s26 = scalar_lea.vmem %s8204_s0, %s5965_s23  ;;  %s8106_s14 = scalar_lea.vmem %s8209_s5, %s5965_s23 }
  0x14   : > { %v228_v1 = vld [vmem:[%s6656_s26] sm:$0xff]  ;;  %v229_v2 = vld [vmem:[%s6656_s26 + $0x8] sm:$0xff]  ;;  %v230_v3 = vld [vmem:[%s6656_s26 + $0x10] sm:$0xff] }
  0x15   : > { %6264 = vmatprep.mubr.msk.f32.mxu0 %vm260_vm0, %v228_v1  ;;  %v231_v4 = vld [vmem:[%s6656_s26 + $0x18] sm:$0xff]  ;;  %v232_v5 = vld [vmem:[%s6656_s26 + $0x20] sm:$0xff]  ;;  %v241_v7 = vld [vmem:[%s6656_s26 + $0x68] sm:$0xff] }
  0x16   : > { %6265 = vmatmul.mubr.msk.f32.vlgmr.msra.gmra.mrb[0].mxu0 %vm260_vm0, %v229_v2  ;;  %v240_v6 = vld [vmem:[%s6656_s26 + $0x60] sm:$0xff]  ;;  %v242_v8 = vld [vmem:[%s6656_s26 + $0x70] sm:$0xff]  ;;  %v233_v9 = vld [vmem:[%s6656_s26 + $0x28] sm:$0xff] }
  0x17   : > { %6267 = vmatprep.mubr.msk.f32.mxu0 %vm260_vm0, %v230_v3  ;;  %6282 = vmatprep.mubr.msk.f32.mxu1 %vm260_vm0, %v240_v6  ;;  %v243_v10 = vld [vmem:[%s6656_s26 + $0x78] sm:$0xff]  ;;  %v234_v11 = vld [vmem:[%s6656_s26 + $0x30] sm:$0xff]  ;;  %v244_v12 = vld [vmem:[%s6656_s26 + $0x80] sm:$0xff] }
  0x18   : > { %6283 = vmatmul.mubr.msk.f32.vlgmr.msra.gmra.mrb[0].mxu1 %vm260_vm0, %v241_v7  ;;  %v235_v13 = vld [vmem:[%s6656_s26 + $0x38] sm:$0xff]  ;;  %v245_v14 = vld [vmem:[%s6656_s26 + $0x88] sm:$0xff]  ;;  %v236_v15 = vld [vmem:[%s6656_s26 + $0x40] sm:$0xff] }
  0x19   : > { %6285 = vmatprep.mubr.msk.f32.mxu1 %vm260_vm0, %v242_v8  ;;  %v246_v16 = vld [vmem:[%s6656_s26 + $0x90] sm:$0xff]  ;;  %v237_v17 = vld [vmem:[%s6656_s26 + $0x48] sm:$0xff]  ;;  %v247_v18 = vld [vmem:[%s6656_s26 + $0x98] sm:$0xff] }
  0x1a   : > { %6268 = vmatmul.mubr.msk.f32.gmra.mrb[2].mxu0 %vm260_vm0, %v231_v4  ;;  %v238_v19 = vld [vmem:[%s6656_s26 + $0x50] sm:$0xff]  ;;  %v248_v20 = vld [vmem:[%s6656_s26 + $0xa0] sm:$0xff]  ;;  %v239_v21 = vld [vmem:[%s6656_s26 + $0x58] sm:$0xff] }
  0x1b   : > { %6270 = vmatprep.mubr.msk.f32.mxu0 %vm260_vm0, %v232_v5  ;;  %v249_v22 = vld [vmem:[%s6656_s26 + $0xa8] sm:$0xff]  ;;  %v250_v23 = vld [vmem:[%s6656_s26 + $0xb0] sm:$0xff]  ;;  %v251_v24 = vld [vmem:[%s6656_s26 + $0xb8] sm:$0xff] }
  0x1c   : > { %6286 = vmatmul.mubr.msk.f32.gmra.mrb[2].mxu1 %vm260_vm0, %v243_v10 }
  0x1d   : > { %6288 = vmatprep.mubr.msk.f32.mxu1 %vm260_vm0, %v244_v12 }
  0x1e   : > { %6271 = vmatmul.mubr.msk.f32.gmra.mrb[4].mxu0 %vm260_vm0, %v233_v9 }
  0x1f   : > { %6273 = vmatprep.mubr.msk.f32.mxu0 %vm260_vm0, %v234_v11 }
  0x20   : > { %6289 = vmatmul.mubr.msk.f32.gmra.mrb[4].mxu1 %vm260_vm0, %v245_v14 }
  0x21   : > { %6291 = vmatprep.mubr.msk.f32.mxu1 %vm260_vm0, %v246_v16 }
  0x22   : > { %6274 = vmatmul.mubr.msk.f32.gmra.mrb[6].mxu0 %vm260_vm0, %v235_v13 }
  0x23   : > { %6276 = vmatprep.mubr.msk.f32.mxu0 %vm260_vm0, %v236_v15 }
  0x24   : > { %6292 = vmatmul.mubr.msk.f32.gmra.mrb[6].mxu1 %vm260_vm0, %v247_v18 }
  0x25   : > { %6294 = vmatprep.mubr.msk.f32.mxu1 %vm260_vm0, %v248_v20 }
  0x26   : > { %6277 = vmatmul.mubr.msk.f32.gmra.mrb[8].mxu0 %vm260_vm0, %v237_v17 }
  0x27   : > { %6279 = vmatprep.mubr.msk.f32.mxu0 %vm260_vm0, %v238_v19 }
  0x28   : > { %6295 = vmatmul.mubr.msk.f32.gmra.mrb[8].mxu1 %vm260_vm0, %v249_v22 }
  0x29   : > { %6297 = vmatprep.mubr.msk.f32.mxu1 %vm260_vm0, %v250_v23 }
  0x2a   : > { %6280 = vmatmul.mubr.msk.f32.gmra.mrb[10].mxu0 %vm260_vm0, %v239_v21 }
  0x2c   : > { %6298 = vmatmul.mubr.msk.f32.gmra.mrb[10].mxu1 %vm260_vm0, %v251_v24 }
  0xe9   : > { %v6266_v32 = vpop.f32.mrb[0].mxu0 }
  0xea   : > { %v6714_v33 = vadd.f32 %v6266_v32, %v6709_v30  ;;  %v399_v34 = vpop.f32.mrb[1].mxu0 }
  0xeb   : > { %v6717_v35 = vadd.f32 %v6709_v30, %v399_v34  ;;  %v6727_v41 = vpop.f32.mrb[0].mxu1 }
  0xec   : > { %8283 = vst [vmem:[#allocation2_spill] sm:$0xff] %v6714_v33  ;;  %v559_v36 = vcombine.high %v6714_v33, %v6714_v33  ;;  %v566_v37 = vrot.slane %v6714_v33, %v6711_v31  ;;  %v6734_v47 = vpop.f32.mrb[1].mxu1 }
  0xed   : > { %8284 = vst [vmem:[#allocation3_spill] sm:$0xff] %v6717_v35  ;;  %v542_v38 = vcombine.high %v6717_v35, %v6717_v35  ;;  %v549_v39 = vrot.slane %v6717_v35, %v6711_v31  ;;  %v6269_v40 = vpop.f32.mrb[2].mxu0 }
  0xee   : > { %v573_v42 = vrot.slane %v559_v36, %v6711_v31  ;;  %v574_v43 = vcombine.high %v566_v37, %v566_v37  ;;  %v1075_v44 = vsel %vm1046_vm1, %v566_v37, -inf  ;;  %v6732_v45 = vadd.f32 %v6269_v40, %v6709_v30  ;;  %v409_v46 = vpop.f32.mrb[3].mxu0 }
  0xef   : > { %v1076_v48 = vrot.slane %v1075_v44, 4  ;;  %v6737_v49 = vrot.slane %v542_v38, %v6711_v31  ;;  %v557_v50 = vcombine.high %v549_v39, %v549_v39  ;;  %v1047_v51 = vsel %vm1046_vm1, %v549_v39, -inf  ;;  %v6744_v61 = vpop.f32.mrb[2].mxu1 }
  0xf0   : > { %8285 = vst [vmem:[#allocation4_spill] sm:$0xff] %v6732_v45  ;;  %v575_v52 = vcombine.high %v573_v42, %v573_v42  ;;  %v1082_v53 = vsel %vm1046_vm1, %v574_v43, -inf  ;;  %v1089_v54 = vsel %vm1046_vm1, %v573_v42, -inf  ;;  %v1048_v55 = vrot.slane %v1047_v51, 4  ;;  %v6752_v3 = vpop.f32.mrb[3].mxu1 }
  0xf1   : > { %v1077_v56 = vmax.f32 %v1075_v44, %v1076_v48  ;;  %v1083_v57 = vrot.slane %v1082_v53, 4  ;;  %v1090_v58 = vrot.slane %v1089_v54, 4  ;;  %v6272_v60 = vpop.f32.mrb[4].mxu0  ;;  %v1054_v0 = vsel %vm1046_vm1, %v557_v50, -inf }
  0xf2   : > { %v6747_v62 = vsel %vm1046_vm1, %v575_v52, -inf  ;;  %v1049_v63 = vmax.f32 %v1047_v51, %v1048_v55  ;;  %v1061_v1 = vsel %vm1046_vm1, %v6737_v49, -inf  ;;  %v419_v2 = vpop.f32.mrb[5].mxu0  ;;  %v1055_v9 = vrot.slane %v1054_v0, 4 }
  0xf3   : > { %v1078_v4 = vrot.slane %v1077_v56, 2  ;;  %v1084_v5 = vmax.f32 %v1082_v53, %v1083_v57  ;;  %v6754_v6 = vmax.f32 %v1089_v54, %v1090_v58  ;;  %v1062_v10 = vrot.slane %v1061_v1, 4  ;;  %v6766_v17 = vpop.f32.mrb[4].mxu1 }
  0xf4   : > { %v1050_v8 = vrot.slane %v1049_v63, 2  ;;  %v593_v11 = vcombine.high %v6732_v45, %v6732_v45  ;;  %v600_v15 = vrot.slane %v6732_v45, %v6711_v31  ;;  %v6770_v19 = vmax.f32 %v1054_v0, %v1055_v9  ;;  %v6777_v23 = vpop.f32.mrb[5].mxu1 }
  0xf5   : > { %v6759_v12 = vmax.f32 %v1077_v56, %v1078_v4  ;;  %v1085_v13 = vrot.slane %v1084_v5, 2  ;;  %v6764_v16 = vpop.f32.mrb[6].mxu0  ;;  %v6772_v20 = vmax.f32 %v1061_v1, %v1062_v10  ;;  %v6787_v38 = vadd.f32 %v6709_v30, %v409_v46 }
  0xf6   : > { %v6768_v18 = vmax.f32 %v1049_v63, %v1050_v8  ;;  %v607_v21 = vrot.slane %v593_v11, %v6711_v31  ;;  %v6775_v22 = vpop.f32.mrb[7].mxu0  ;;  %v608_v26 = vcombine.high %v600_v15, %v600_v15  ;;  %v1131_v27 = vsel %vm1046_vm1, %v600_v15, -inf }
  0xf7   : > { %v6780_v25 = vmax.f32 %v1084_v5, %v1085_v13  ;;  %v1132_v32 = vrot.slane %v1131_v27, 4  ;;  %8286 = vst [vmem:[#allocation5_spill] sm:$0xff] %v6787_v38  ;;  %v6790_v39 = vadd.f32 %v6272_v60, %v6709_v30  ;;  %v6794_v42 = vpop.f32.mrb[6].mxu1  ;;  %v6800_v50 = vadd.f32 %v6709_v30, %v419_v2 }
  0xf8   : > { %v609_v29 = vcombine.high %v607_v21, %v607_v21  ;;  %v1145_v34 = vsel %vm1046_vm1, %v607_v21, -inf  ;;  %v1138_v36 = vsel %vm1046_vm1, %v608_v26, -inf  ;;  %v6804_v52 = vpop.f32.mrb[7].mxu1  ;;  %v576_v54 = vcombine.high %v6787_v38, %v6787_v38 }
  0xf9   : > { %v1146_v37 = vrot.slane %v1145_v34, 4  ;;  %8287 = vst [vmem:[#allocation6_spill] sm:$0xff] %v6790_v39  ;;  %v6792_v40 = vpop.f32.mrb[8].mxu0  ;;  %v1133_v43 = vmax.f32 %v1131_v27, %v1132_v32  ;;  %v1139_v44 = vrot.slane %v1138_v36, 4  ;;  %8288 = vst [vmem:[#allocation7_spill] sm:$0xff] %v6800_v50  ;;  %v583_v55 = vrot.slane %v6787_v38, %v6711_v31 }
  0xfa   : > { %v6797_v48 = vsel %vm1046_vm1, %v609_v29, -inf  ;;  %v6802_v51 = vpop.f32.mrb[9].mxu0  ;;  %v627_v58 = vcombine.high %v6790_v39, %v6790_v39  ;;  %v634_v60 = vrot.slane %v6790_v39, %v6711_v31  ;;  %v6819_v0 = vrot.slane %v576_v54, %v6711_v31 }
  0xfb   : > { %v6806_v46 = vmax.f32 %v1145_v34, %v1146_v37  ;;  %v1134_v56 = vrot.slane %v1133_v43, 2  ;;  %v1140_v57 = vmax.f32 %v1138_v36, %v1139_v44  ;;  %v591_v1 = vcombine.high %v583_v55, %v583_v55  ;;  %v6824_v5 = vpop.f32.mrb[8].mxu1 }
  0xfc   : > { %v1103_v2 = vsel %vm1046_vm1, %v583_v55, -inf  ;;  %v641_v11 = vrot.slane %v627_v58, %v6711_v31  ;;  %v1117_v26 = vsel %vm1046_vm1, %v6819_v0, -inf  ;;  %v642_v27 = vcombine.high %v634_v60, %v634_v60 }
  0xfd   : > { %v6822_v4 = vpop.f32.mrb[10].mxu0  ;;  %v6826_v8 = vmax.f32 %v1133_v43, %v1134_v56  ;;  %v1141_v9 = vrot.slane %v1140_v57, 2  ;;  %v1104_v10 = vrot.slane %v1103_v2, 4  ;;  %v1110_v21 = vsel %vm1046_vm1, %v591_v1, -inf }
  0xfe   : > { %v6829_v13 = vpop.f32.mrb[11].mxu0  ;;  %v1111_v36 = vrot.slane %v1110_v21, 4  ;;  %v1118_v37 = vrot.slane %v1117_v26, 4  ;;  %v643_v43 = vcombine.high %v641_v11, %v641_v11  ;;  %v1187_v44 = vsel %vm1046_vm1, %v634_v60, -inf }
  0xff   : > { %v6837_v32 = vmax.f32 %v1140_v57, %v1141_v9  ;;  %v1105_v34 = vmax.f32 %v1103_v2, %v1104_v10  ;;  %v1194_v54 = vsel %vm1046_vm1, %v642_v27, -inf  ;;  %v1188_v58 = vrot.slane %v1187_v44, 4 }
 0x100   : > { %v6841_v56 = vmax.f32 %v1110_v21, %v1111_v36  ;;  %v1195_v1 = vrot.slane %v1194_v54, 4  ;;  %v6843_v53 = vmax.f32 %v1117_v26, %v1118_v37  ;;  %v1201_v63 = vsel %vm1046_vm1, %v641_v11, -inf }
 0x101   : > { %v1106_v55 = vrot.slane %v1105_v34, 2  ;;  %v6847_v57 = vsel %vm1046_vm1, %v643_v43, -inf  ;;  %v610_v2 = vcombine.high %v6800_v50, %v6800_v50  ;;  %v1189_v10 = vmax.f32 %v1187_v44, %v1188_v58 }
 0x102   : > { %v1196_v27 = vmax.f32 %v1194_v54, %v1195_v1  ;;  %v1202_v21 = vrot.slane %v1201_v63, 4  ;;  %v617_v26 = vrot.slane %v6800_v50, %v6711_v31  ;;  %v6860_v29 = vadd.f32 %v6764_v16, %v6709_v30 }
 0x103   : > { %v6851_v9 = vmax.f32 %v1105_v34, %v1106_v55  ;;  %v624_v11 = vrot.slane %v610_v2, %v6711_v31  ;;  %v1190_v37 = vrot.slane %v1189_v10, 2  ;;  %v6864_v34 = vadd.f32 %v6709_v30, %v6775_v22 }
 0x104   : > { %v1197_v43 = vrot.slane %v1196_v27, 2  ;;  %8289 = vst [vmem:[#allocation8_spill] sm:$0xff] %v6860_v29  ;;  %v6866_v44 = vmax.f32 %v1201_v63, %v1202_v21  ;;  %v625_v54 = vcombine.high %v617_v26, %v617_v26  ;;  %v1159_v58 = vsel %vm1046_vm1, %v617_v26, -inf }
 0x105   : > { %8290 = vst [vmem:[#allocation9_spill] sm:$0xff] %v6864_v34  ;;  %v626_v55 = vcombine.high %v624_v11, %v624_v11  ;;  %v6869_v1 = vmax.f32 %v1189_v10, %v1190_v37  ;;  %v1160_v2 = vrot.slane %v1159_v58, 4  ;;  %v1173_v7 = vsel %vm1046_vm1, %v624_v11, -inf }
 0x106   : > { %v6871_v36 = vmax.f32 %v1196_v27, %v1197_v43  ;;  %v1166_v14 = vsel %vm1046_vm1, %v625_v54, -inf  ;;  %v1174_v24 = vrot.slane %v1173_v7, 4  ;;  %v661_v27 = vcombine.high %v6860_v29, %v6860_v29  ;;  %v6889_v43 = vpop.f32.mrb[9].mxu1 }
 0x107   : > { %v6877_v22 = vsel %vm1046_vm1, %v626_v55, -inf  ;;  %v1161_v21 = vmax.f32 %v1159_v58, %v1160_v2  ;;  %v1167_v15 = vrot.slane %v1166_v14, 4  ;;  %v668_v11 = vrot.slane %v6860_v29, %v6711_v31  ;;  %8291 = vst [vmem:[#allocation10_spill] sm:$0xff] %v6889_v43 }
 0x108   : > { %v6881_v26 = vmax.f32 %v1173_v7, %v1174_v24  ;;  %v644_v37 = vcombine.high %v6864_v34, %v6864_v34  ;;  %v651_v58 = vrot.slane %v6864_v34, %v6711_v31  ;;  %v6895_v7 = vadd.f32 %v6792_v40, %v6709_v30  ;;  %v6905_v34 = vpop.f32.mrb[10].mxu1 }
 0x109   : > { %v1162_v54 = vrot.slane %v1161_v21, 2  ;;  %v1168_v55 = vmax.f32 %v1166_v14, %v1167_v15  ;;  %v675_v2 = vrot.slane %v661_v27, %v6711_v31  ;;  %v676_v16 = vcombine.high %v668_v11, %v668_v11  ;;  %8293 = vst [vmem:[#allocation12_spill] sm:$0xff] %v6905_v34 }
 0x10a   : > { %8292 = vst [vmem:[#allocation11_spill] sm:$0xff] %v6895_v7  ;;  %v1243_v63 = vsel %vm1046_vm1, %v668_v11, -inf  ;;  %v658_v14 = vrot.slane %v644_v37, %v6711_v31  ;;  %v659_v40 = vcombine.high %v651_v58, %v651_v58  ;;  %v1215_v37 = vsel %vm1046_vm1, %v651_v58, -inf }
 0x10b   : > { %v6900_v10 = vmax.f32 %v1161_v21, %v1162_v54  ;;  %v1169_v60 = vrot.slane %v1168_v55, 2  ;;  %v1244_v59 = vrot.slane %v1243_v63, 4  ;;  %v677_v15 = vcombine.high %v675_v2, %v675_v2 }
 0x10c   : > { %v1250_v28 = vsel %vm1046_vm1, %v676_v16, -inf  ;;  %v1257_v29 = vsel %vm1046_vm1, %v675_v2, -inf  ;;  %v660_v50 = vcombine.high %v658_v14, %v658_v14  ;;  %v1216_v38 = vrot.slane %v1215_v37, 4 }
 0x10d   : > { %v6908_v27 = vmax.f32 %v1168_v55, %v1169_v60  ;;  %v1245_v39 = vmax.f32 %v1243_v63, %v1244_v59  ;;  %v1251_v11 = vrot.slane %v1250_v28, 4  ;;  %v1258_v21 = vrot.slane %v1257_v29, 4 }
 0x10e   : > { %v6911_v54 = vsel %vm1046_vm1, %v677_v15, -inf  ;;  %v1222_v24 = vsel %vm1046_vm1, %v659_v40, -inf  ;;  %v1229_v60 = vsel %vm1046_vm1, %v658_v14, -inf  ;;  %v6920_v59 = vsel %vm1046_vm1, %v660_v50, -inf }
 0x10f   : > { %8294 = vst [vmem:[#allocation13_spill] sm:$0xff] %v6911_v54  ;;  %v1246_v45 = vrot.slane %v1245_v39, 2  ;;  %v1252_v16 = vmax.f32 %v1250_v28, %v1251_v11  ;;  %v6915_v33 = vmax.f32 %v1257_v29, %v1258_v21  ;;  %v1217_v15 = vmax.f32 %v1215_v37, %v1216_v38 }
 0x110   : > { %v1223_v35 = vrot.slane %v1222_v24, 4  ;;  %v1230_v28 = vrot.slane %v1229_v60, 4  ;;  %v695_v29 = vcombine.high %v6895_v7, %v6895_v7 }
 0x111   : > { %8295 = vst [vmem:[#allocation14_spill] sm:$0xff] %v6915_v33  ;;  %v6922_v63 = vmax.f32 %v1245_v39, %v1246_v45  ;;  %v1253_v55 = vrot.slane %v1252_v16, 2  ;;  %v1218_v14 = vrot.slane %v1217_v15, 2  ;;  %v702_v45 = vrot.slane %v6895_v7, %v6711_v31 }
 0x112   : > { %v1224_v50 = vmax.f32 %v1222_v24, %v1223_v35  ;;  %v6931_v2 = vmax.f32 %v1229_v60, %v1230_v28  ;;  %v709_v38 = vrot.slane %v695_v29, %v6711_v31  ;;  %v6938_v39 = vadd.f32 %v6709_v30, %v6802_v51 }
 0x113   : > { %v6929_v21 = vmax.f32 %v1252_v16, %v1253_v55  ;;  %v6940_v37 = vmax.f32 %v1217_v15, %v1218_v14  ;;  %v6944_v16 = vadd.f32 %v6822_v4, %v6709_v30  ;;  %v6948_v35 = vadd.f32 %v6709_v30, %v6829_v13 }
 0x114   : > { %8297 = vst [vmem:[#allocation16_spill] sm:$0xff] %v6938_v39  ;;  %v1225_v58 = vrot.slane %v1224_v50, 2  ;;  %v710_v60 = vcombine.high %v702_v45, %v702_v45  ;;  %v711_v55 = vcombine.high %v709_v38, %v709_v38  ;;  %v1299_v28 = vsel %vm1046_vm1, %v702_v45, -inf }
 0x115   : > { %8296 = vst [vmem:[#allocation15_spill] sm:$0xff] %v6929_v21  ;;  %8298 = vst [vmem:[#allocation17_spill] sm:$0xff] %v6944_v16  ;;  %v1300_v15 = vrot.slane %v1299_v28, 4  ;;  %v1313_v14 = vsel %vm1046_vm1, %v709_v38, -inf  ;;  %v678_v13 = vcombine.high %v6938_v39, %v6938_v39 }
 0x116   : > { %8299 = vst [vmem:[#allocation18_spill] sm:$0xff] %v6948_v35  ;;  %v6953_v29 = vmax.f32 %v1224_v50, %v1225_v58  ;;  %v1306_v4 = vsel %vm1046_vm1, %v710_v60, -inf  ;;  %v1314_v40 = vrot.slane %v1313_v14, 4  ;;  %v6958_v11 = vsel %vm1046_vm1, %v711_v55, -inf }
 0x117   : > { %8300 = vst [vmem:[#allocation19_spill] sm:$0xff] %v6958_v11  ;;  %v1301_v24 = vmax.f32 %v1299_v28, %v1300_v15  ;;  %v1307_v7 = vrot.slane %v1306_v4, 4  ;;  %v685_v58 = vrot.slane %v6938_v39, %v6711_v31  ;;  %v692_v38 = vrot.slane %v678_v13, %v6711_v31  ;;  %v6973_v15 = vpop.f32.mrb[11].mxu1 }
 0x118   : > { %v6965_v50 = vmax.f32 %v1313_v14, %v1314_v40  ;;  %v729_v60 = vcombine.high %v6944_v16, %v6944_v16  ;;  %v736_v55 = vrot.slane %v6944_v16, %v6711_v31  ;;  %8302 = vst [vmem:[#allocation21_spill] sm:$0xff] %v6973_v15 }
 0x119   : > { %v1302_v51 = vrot.slane %v1301_v24, 2  ;;  %v1308_v34 = vmax.f32 %v1306_v4, %v1307_v7  ;;  %v693_v43 = vcombine.high %v685_v58, %v685_v58  ;;  %v1271_v28 = vsel %vm1046_vm1, %v685_v58, -inf }
 0x11a   : > { %8301 = vst [vmem:[#allocation20_spill] sm:$0xff] %v6965_v50  ;;  %v694_v39 = vcombine.high %v692_v38, %v692_v38  ;;  %v1272_v40 = vrot.slane %v1271_v28, 4  ;;  %v1285_v14 = vsel %vm1046_vm1, %v692_v38, -inf  ;;  %v743_v4 = vrot.slane %v729_v60, %v6711_v31 }
 0x11b   : > { %v6977_v13 = vmax.f32 %v1301_v24, %v1302_v51  ;;  %v1309_v11 = vrot.slane %v1308_v34, 2  ;;  %v1278_v54 = vsel %vm1046_vm1, %v693_v43, -inf  ;;  %v1286_v33 = vrot.slane %v1285_v14, 4 }
 0x11c   : > { %v1273_v16 = vmax.f32 %v1271_v28, %v1272_v40  ;;  %v1279_v21 = vrot.slane %v1278_v54, 4  ;;  %v6981_v7 = vsel %vm1046_vm1, %v694_v39, -inf  ;;  %v744_v50 = vcombine.high %v736_v55, %v736_v55 }
 0x11d   : > { %8303 = vst [vmem:[#allocation22_spill] sm:$0xff] %v6977_v13  ;;  %8304 = vst [vmem:[#allocation23_spill] sm:$0xff] %v6981_v7  ;;  %v6985_v45 = vmax.f32 %v1308_v34, %v1309_v11  ;;  %v6987_v15 = vmax.f32 %v1285_v14, %v1286_v33  ;;  %v745_v43 = vcombine.high %v743_v4, %v743_v4  ;;  %v1355_v40 = vsel %vm1046_vm1, %v736_v55, -inf }
 0x11e   : > { %v1274_v51 = vrot.slane %v1273_v16, 2  ;;  %v1280_v38 = vmax.f32 %v1278_v54, %v1279_v21  ;;  %v1369_v39 = vsel %vm1046_vm1, %v743_v4, -inf  ;;  %v712_v60 = vcombine.high %v6948_v35, %v6948_v35 }
 0x11f   : > { %8305 = vst [vmem:[#allocation24_spill] sm:$0xff] %v6985_v45  ;;  %8306 = vst [vmem:[#allocation25_spill] sm:$0xff] %v6987_v15  ;;  %v1356_v33 = vrot.slane %v1355_v40, 4  ;;  %v1362_v11 = vsel %vm1046_vm1, %v744_v50, -inf  ;;  %v1370_v24 = vrot.slane %v1369_v39, 4  ;;  %v6999_v54 = vsel %vm1046_vm1, %v745_v43, -inf }
 0x120   : > { %v6995_v58 = vmax.f32 %v1273_v16, %v1274_v51  ;;  %v1281_v34 = vrot.slane %v1280_v38, 2  ;;  %v1363_v14 = vrot.slane %v1362_v11, 4  ;;  %8307 = vst [vmem:[#allocation26_spill] sm:$0xff] %v6999_v54  ;;  %v719_v21 = vrot.slane %v6948_v35, %v6711_v31 }
 0x121   : > { %v1357_v28 = vmax.f32 %v1355_v40, %v1356_v33  ;;  %v7007_v45 = vmax.f32 %v1369_v39, %v1370_v24  ;;  %v726_v50 = vrot.slane %v712_v60, %v6711_v31  ;;  %v7013_v15 = vadd.f32 %v6727_v41, %v6709_v30 }
 0x122   : > { %v7004_v4 = vmax.f32 %v1280_v38, %v1281_v34  ;;  %v1364_v51 = vmax.f32 %v1362_v11, %v1363_v14  ;;  %v727_v13 = vcombine.high %v719_v21, %v719_v21  ;;  %v1327_v43 = vsel %vm1046_vm1, %v719_v21, -inf }
 0x123   : > { %8308 = vst [vmem:[#allocation27_spill] sm:$0xff] %v7007_v45  ;;  %v1358_v7 = vrot.slane %v1357_v28, 2  ;;  %8309 = vst [vmem:[#allocation28_spill] sm:$0xff] %v7013_v15  ;;  %v1052_v55 = vrot.slane %v6768_v18, 1  ;;  %v728_v34 = vcombine.high %v726_v50, %v726_v50  ;;  %v1328_v33 = vrot.slane %v1327_v43, 4 }
 0x124   : > { %v1365_v38 = vrot.slane %v1364_v51, 2  ;;  %v1334_v24 = vsel %vm1046_vm1, %v727_v13, -inf  ;;  %v1341_v39 = vsel %vm1046_vm1, %v726_v50, -inf  ;;  %v763_v60 = vcombine.high %v7013_v15, %v7013_v15 }
 0x125   : > { %v7017_v11 = vmax.f32 %v1357_v28, %v1358_v7  ;;  %v1329_v41 = vmax.f32 %v1327_v43, %v1328_v33  ;;  %v1335_v21 = vrot.slane %v1334_v24, 4  ;;  %v1342_v16 = vrot.slane %v1341_v39, 4 }
 0x126   : > { %v7023_v14 = vmax.f32 %v1364_v51, %v1365_v38  ;;  %v7027_v40 = vsel %vm1046_vm1, %v728_v34, -inf  ;;  %v770_v7 = vrot.slane %v7013_v15, %v6711_v31  ;;  %v777_v13 = vrot.slane %v763_v60, %v6711_v31 }
 0x127   : > { %8310 = vst [vmem:[#allocation29_spill] sm:$0xff] %v7017_v11  ;;  %8312 = vst [vmem:[#allocation31_spill] sm:$0xff] %v7027_v40  ;;  %v1330_v28 = vrot.slane %v1329_v41, 2  ;;  %v1336_v50 = vmax.f32 %v1334_v24, %v1335_v21  ;;  %v7032_v54 = vmax.f32 %v1341_v39, %v1342_v16  ;;  %v1053_v60 = vmax.f32 %v6768_v18, %v1052_v55 }
 0x128   : > { %8311 = vst [vmem:[#allocation30_spill] sm:$0xff] %v7023_v14  ;;  %v778_v43 = vcombine.high %v770_v7, %v770_v7  ;;  %v779_v38 = vcombine.high %v777_v13, %v777_v13  ;;  %v1411_v33 = vsel %vm1046_vm1, %v770_v7, -inf  ;;  %v1425_v35 = vsel %vm1046_vm1, %v777_v13, -inf }
 0x129   : > { %v7037_v34 = vmax.f32 %v1329_v41, %v1330_v28  ;;  %v1337_v45 = vrot.slane %v1336_v50, 2  ;;  %v1412_v14 = vrot.slane %v1411_v33, 4  ;;  %v1426_v16 = vrot.slane %v1425_v35, 4 }
 0x12a   : > { %v1418_v24 = vsel %vm1046_vm1, %v778_v43, -inf  ;;  %v7042_v39 = vsel %vm1046_vm1, %v779_v38, -inf  ;;  %v8315_v15 = vrot.slane %v6770_v19, 2  ;;  %v1064_v11 = vrot.slane %v6772_v20, 2 }
 0x12b   : > { %8313 = vst [vmem:[#allocation32_spill] sm:$0xff] %v7042_v39  ;;  %v7046_v7 = vmax.f32 %v1336_v50, %v1337_v45  ;;  %v1413_v13 = vmax.f32 %v1411_v33, %v1412_v14  ;;  %v1419_v41 = vrot.slane %v1418_v24, 4  ;;  %v7048_v28 = vmax.f32 %v1425_v35, %v1426_v16 }
 0x12c   : > { %v1058_v43 = vmax.f32 %v6770_v19, %v8315_v15  ;;  %v8316_v18 = vcombine.high %v6737_v49, %v6737_v49  ;;  %v7061_v55 = vadd.f32 %v6709_v30, %v6734_v47  ;;  %v1065_v50 = vmax.f32 %v6772_v20, %v1064_v11 }
 0x12d   : > { %8314 = vst [vmem:[#allocation33_spill] sm:$0xff] %v7048_v28  ;;  %v1414_v38 = vrot.slane %v1413_v13, 2  ;;  %v1420_v40 = vmax.f32 %v1418_v24, %v1419_v41 }
 0x12e   : > { %v1068_v45 = vsel %vm1046_vm1, %v8316_v18, -inf  ;;  %8317 = vst [vmem:[#allocation34_spill] sm:$0xff] %v7061_v55  ;;  %v1059_v14 = vrot.slane %v1058_v43, 1  ;;  %v746_v24 = vcombine.high %v7061_v55, %v7061_v55  ;;  %v753_v49 = vrot.slane %v7061_v55, %v6711_v31 }
 0x12f   : > { %v1069_v33 = vrot.slane %v1068_v45, 4  ;;  %v7065_v19 = vmax.f32 %v1413_v13, %v1414_v38  ;;  %v1421_v15 = vrot.slane %v1420_v40, 2  ;;  %v1066_v41 = vrot.slane %v1065_v50, 1 }
 0x130   : > { %v1060_v16 = vmax.f32 %v1058_v43, %v1059_v14  ;;  %v7073_v18 = vadd.f32 %v6744_v61, %v6709_v30  ;;  %v760_v13 = vrot.slane %v746_v24, %v6711_v31  ;;  %v761_v38 = vcombine.high %v753_v49, %v753_v49 }
 0x131   : > { %v1070_v47 = vmax.f32 %v1068_v45, %v1069_v33  ;;  %v7076_v11 = vmax.f32 %v1420_v40, %v1421_v15  ;;  %v1067_v51 = vmax.f32 %v1065_v50, %v1066_v41  ;;  %v1383_v55 = vsel %vm1046_vm1, %v753_v49, -inf }
 0x132   : > { %8318 = vst [vmem:[#allocation35_spill] sm:$0xff] %v7073_v18  ;;  %v1724_v21 = vsel %vm1723_vm2, %v1060_v16, %v1053_v60  ;;  %v762_v43 = vcombine.high %v760_v13, %v760_v13  ;;  %v1384_v14 = vrot.slane %v1383_v55, 4  ;;  %v1390_v45 = vsel %vm1046_vm1, %v761_v38, -inf }
 0x133   : > { %v1071_v35 = vrot.slane %v1070_v47, 2  ;;  %v1397_v61 = vsel %vm1046_vm1, %v760_v13, -inf  ;;  %v1726_v20 = vsel %vm1725_vm3, %v1067_v51, %v1724_v21  ;;  %v1391_v40 = vrot.slane %v1390_v45, 4 }
 0x134   : > { %v1398_v15 = vrot.slane %v1397_v61, 4  ;;  %v1385_v39 = vmax.f32 %v1383_v55, %v1384_v14  ;;  %v7085_v24 = vsel %vm1046_vm1, %v762_v43, -inf  ;;  %v797_v60 = vcombine.high %v7073_v18, %v7073_v18 }
 0x135   : > { %v1072_v33 = vmax.f32 %v1070_v47, %v1071_v35  ;;  %v804_v50 = vrot.slane %v7073_v18, %v6711_v31  ;;  %v1392_v16 = vmax.f32 %v1390_v45, %v1391_v40 }
 0x136   : > { %v7091_v41 = vmax.f32 %v1397_v61, %v1398_v15  ;;  %v1386_v47 = vrot.slane %v1385_v39, 2  ;;  %v811_v51 = vrot.slane %v797_v60, %v6711_v31 }
 0x137   : > { %v1073_v49 = vrot.slane %v1072_v33, 1  ;;  %v812_v21 = vcombine.high %v804_v50, %v804_v50  ;;  %v1467_v55 = vsel %vm1046_vm1, %v804_v50, -inf  ;;  %v1393_v38 = vrot.slane %v1392_v16, 2 }
 0x138   : > { %v1468_v14 = vrot.slane %v1467_v55, 4  ;;  %v7097_v28 = vmax.f32 %v1385_v39, %v1386_v47  ;;  %v813_v18 = vcombine.high %v811_v51, %v811_v51  ;;  %v1481_v61 = vsel %vm1046_vm1, %v811_v51, -inf }
 0x139   : > { %v1074_v13 = vmax.f32 %v1072_v33, %v1073_v49  ;;  %v1474_v45 = vsel %vm1046_vm1, %v812_v21, -inf  ;;  %v7104_v15 = vmax.f32 %v1392_v16, %v1393_v38  ;;  %v1482_v39 = vrot.slane %v1481_v61, 4 }
 0x13a   : > { %v1469_v60 = vmax.f32 %v1467_v55, %v1468_v14  ;;  %v1475_v35 = vrot.slane %v1474_v45, 4  ;;  %v7110_v50 = vsel %vm1046_vm1, %v813_v18, -inf  ;;  %v1108_v49 = vrot.slane %v6851_v9, 1 }
 0x13b   : > { %v7102_v40 = vsel %vm1727_vm4, %v1074_v13, %v1726_v20  ;;  %v8320_v16 = vrot.slane %v6841_v56, 2  ;;  %v7117_v55 = vmax.f32 %v1481_v61, %v1482_v39  ;;  %v1120_v38 = vrot.slane %v6843_v53, 2 }
 0x13c   : > { %8319 = vst [vmem:[#allocation36_spill] sm:$0xff] %v7102_v40  ;;  %1729 = vrot.lane.b32.xlu0 %v7102_v40, %s6603_s29  ;;  %v1470_v47 = vrot.slane %v1469_v60, 2  ;;  %v1476_v51 = vmax.f32 %v1474_v45, %v1475_v35  ;;  %v1109_v13 = vmax.f32 %v6851_v9, %v1108_v49  ;;  %v8321_v18 = vcombine.high %v6819_v0, %v6819_v0 }
 0x13d   : > { %v1114_v21 = vmax.f32 %v6841_v56, %v8320_v16  ;;  %v1121_v56 = vmax.f32 %v6843_v53, %v1120_v38  ;;  %v8322_v61 = vrot.slane %v6759_v12, 1  ;;  %v1087_v39 = vrot.slane %v6780_v25, 1 }
 0x13e   : > { %v1124_v14 = vsel %vm1046_vm1, %v8321_v18, -inf  ;;  %v7125_v43 = vmax.f32 %v1469_v60, %v1470_v47  ;;  %v1477_v35 = vrot.slane %v1476_v51, 2  ;;  %v8323_v40 = vrot.slane %v6754_v6, 2 }
 0x13f   : > { %v1115_v45 = vrot.slane %v1114_v21, 1  ;;  %v1125_v20 = vrot.slane %v1124_v14, 4  ;;  %v1081_v9 = vmax.f32 %v6759_v12, %v8322_v61  ;;  %v1122_v47 = vrot.slane %v1121_v56, 1 }
 0x140   : > { %v7134_v0 = vmax.f32 %v1476_v51, %v1477_v35  ;;  %v1088_v18 = vmax.f32 %v6780_v25, %v1087_v39  ;;  %v1093_v33 = vmax.f32 %v6754_v6, %v8323_v40  ;;  %v8324_v53 = vrot.slane %v6747_v62, 4 }
 0x141   : > { %v1116_v16 = vmax.f32 %v1114_v21, %v1115_v45  ;;  %v1126_v60 = vmax.f32 %v1124_v14, %v1125_v20  ;;  %v7146_v51 = vadd.f32 %v6709_v30, %v6752_v3  ;;  %v7150_v20 = vadd.f32 %v6766_v17, %v6709_v30 }
 0x142   : > { %v1098_v38 = vmax.f32 %v6747_v62, %v8324_v53  ;;  %v1123_v25 = vmax.f32 %v1121_v56, %v1122_v47  ;;  %v1094_v21 = vrot.slane %v1093_v33, 1  ;;  %v1810_v6 = vsel %vm1723_vm2, %v1088_v18, %v1081_v9 }
 0x143   : > { %v1127_v12 = vrot.slane %v1126_v60, 2  ;;  %v1893_v61 = vsel %vm1723_vm2, %v1116_v16, %v1109_v13  ;;  %8325 = vst [vmem:[#allocation37_spill] sm:$0xff] %v7146_v51  ;;  %8326 = vst [vmem:[#allocation38_spill] sm:$0xff] %v7150_v20  ;;  %v780_v62 = vcombine.high %v7146_v51, %v7146_v51  ;;  %v787_v13 = vrot.slane %v7146_v51, %v6711_v31 }
 0x144   : > { %v1099_v14 = vrot.slane %v1098_v38, 2  ;;  %v831_v3 = vcombine.high %v7150_v20, %v7150_v20  ;;  %v1894_v35 = vsel %vm1725_vm3, %v1123_v25, %v1893_v61  ;;  %v1095_v45 = vmax.f32 %v1093_v33, %v1094_v21 }
 0x145   : > { %v1128_v40 = vmax.f32 %v1126_v60, %v1127_v12  ;;  %v838_v56 = vrot.slane %v7150_v20, %v6711_v31  ;;  %v794_v9 = vrot.slane %v780_v62, %v6711_v31  ;;  %v795_v16 = vcombine.high %v787_v13, %v787_v13 }
 0x146   : > { %v1100_v17 = vmax.f32 %v1098_v38, %v1099_v14  ;;  %v1439_v60 = vsel %vm1046_vm1, %v787_v13, -inf  ;;  %v1811_v18 = vsel %vm1725_vm3, %v1095_v45, %v1810_v6  ;;  %v845_v12 = vrot.slane %v831_v3, %v6711_v31 }
 0x147   : > { %v1129_v39 = vrot.slane %v1128_v40, 1  ;;  %v1440_v53 = vrot.slane %v1439_v60, 4  ;;  %v796_v51 = vcombine.high %v794_v9, %v794_v9  ;;  %v1446_v33 = vsel %vm1046_vm1, %v795_v16, -inf }
 0x148   : > { %v1101_v47 = vrot.slane %v1100_v17, 1  ;;  %v1453_v38 = vsel %vm1046_vm1, %v794_v9, -inf  ;;  %v1447_v21 = vrot.slane %v1446_v33, 4  ;;  %v846_v6 = vcombine.high %v838_v56, %v838_v56 }
 0x149   : > { %v1130_v49 = vmax.f32 %v1128_v40, %v1129_v39  ;;  %v1441_v25 = vmax.f32 %v1439_v60, %v1440_v53  ;;  %v1454_v14 = vrot.slane %v1453_v38, 4  ;;  %v7172_v13 = vsel %vm1046_vm1, %v796_v51, -inf }
 0x14a   : > { %v1102_v61 = vmax.f32 %v1100_v17, %v1101_v47  ;;  %v847_v45 = vcombine.high %v845_v12, %v845_v12  ;;  %v1448_v39 = vmax.f32 %v1446_v33, %v1447_v21  ;;  %v1523_v51 = vsel %vm1046_vm1, %v838_v56, -inf }
 0x14b   : > { %v7169_v62 = vsel %vm1727_vm4, %v1130_v49, %v1894_v35  ;;  %v1442_v3 = vrot.slane %v1441_v25, 2  ;;  %v7179_v17 = vmax.f32 %v1453_v38, %v1454_v14  ;;  %v1530_v35 = vsel %vm1046_vm1, %v846_v6, -inf }
 0x14c   : > { %8327 = vst [vmem:[#allocation39_spill] sm:$0xff] %v7169_v62  ;;  %1896 = vrot.lane.b32.xlu1 %v7169_v62, %s6603_s29  ;;  %v7177_v40 = vsel %vm1727_vm4, %v1102_v61, %v1811_v18  ;;  %v1537_v9 = vsel %vm1046_vm1, %v845_v12, -inf  ;;  %v1449_v60 = vrot.slane %v1448_v39, 2  ;;  %v1524_v18 = vrot.slane %v1523_v51, 4 }
 0x14d   : > { %8328 = vst [vmem:[#allocation40_spill] sm:$0xff] %v7177_v40  ;;  %1813 = vrot.lane.b32.xlu0 %v7177_v40, %s6603_s29  ;;  %v7187_v16 = vmax.f32 %v1441_v25, %v1442_v3  ;;  %v1531_v53 = vrot.slane %v1530_v35, 4  ;;  %v1538_v33 = vrot.slane %v1537_v9, 4  ;;  %v7191_v38 = vsel %vm1046_vm1, %v847_v45, -inf }
 0x14e   : > { %v8329_v61 = vrot.slane %v6826_v8, 1  ;;  %v7197_v14 = vmax.f32 %v1448_v39, %v1449_v60  ;;  %v1525_v12 = vmax.f32 %v1523_v51, %v1524_v18  ;;  %v1143_v49 = vrot.slane %v6837_v32, 1 }
 0x14f   : > { %v1532_v6 = vmax.f32 %v1530_v35, %v1531_v53  ;;  %v7200_v3 = vmax.f32 %v1537_v9, %v1538_v33  ;;  %v8330_v47 = vrot.slane %v6806_v46, 2  ;;  %v8331_v62 = vrot.slane %v6797_v48, 4 }
 0x150   : > { %v1137_v21 = vmax.f32 %v6826_v8, %v8329_v61  ;;  %v1526_v20 = vrot.slane %v1525_v12, 2  ;;  %v8332_v39 = vrot.slane %v6900_v10, 1  ;;  %v1171_v60 = vrot.slane %v6908_v27, 1 }
 0x151   : > { %v1149_v45 = vmax.f32 %v6806_v46, %v8330_v47  ;;  %v1154_v8 = vmax.f32 %v6797_v48, %v8331_v62  ;;  %v1533_v35 = vrot.slane %v1532_v6, 2  ;;  %v1144_v18 = vmax.f32 %v6837_v32, %v1143_v49 }
 0x152   : > { %v1165_v51 = vmax.f32 %v6900_v10, %v8332_v39  ;;  %v7215_v33 = vmax.f32 %v1525_v12, %v1526_v20  ;;  %v1172_v47 = vmax.f32 %v6908_v27, %v1171_v60  ;;  %v8333_v61 = vrot.slane %v6881_v26, 2 }
 0x153   : > { %v1150_v53 = vrot.slane %v1149_v45, 1  ;;  %v1155_v46 = vrot.slane %v1154_v8, 2  ;;  %v7221_v62 = vmax.f32 %v1532_v6, %v1533_v35  ;;  %v1976_v39 = vsel %vm1723_vm2, %v1144_v18, %v1137_v21 }
 0x154   : > { %v1177_v48 = vmax.f32 %v6881_v26, %v8333_v61  ;;  %v8334_v25 = vrot.slane %v6877_v22, 4  ;;  %v2059_v12 = vsel %vm1723_vm2, %v1172_v47, %v1165_v51  ;;  %v7232_v26 = vadd.f32 %v6709_v30, %v6777_v23 }
 0x155   : > { %v1151_v10 = vmax.f32 %v1149_v45, %v1150_v53  ;;  %v1156_v20 = vmax.f32 %v1154_v8, %v1155_v46  ;;  %v7236_v21 = vadd.f32 %v6794_v42, %v6709_v30  ;;  %v1199_v8 = vrot.slane %v6871_v36, 1 }
 0x156   : > { %v1182_v9 = vmax.f32 %v6877_v22, %v8334_v25  ;;  %v1178_v49 = vrot.slane %v1177_v48, 1  ;;  %8335 = vst [vmem:[#allocation41_spill] sm:$0xff] %v7232_v26  ;;  %v8337_v22 = vrot.slane %v6869_v1, 1  ;;  %v814_v35 = vcombine.high %v7232_v26, %v7232_v26 }
 0x157   : > { %v1977_v27 = vsel %vm1725_vm3, %v1151_v10, %v1976_v39  ;;  %8336 = vst [vmem:[#allocation42_spill] sm:$0xff] %v7236_v21  ;;  %v1157_v6 = vrot.slane %v1156_v20, 1  ;;  %v821_v23 = vrot.slane %v7232_v26, %v6711_v31  ;;  %v865_v18 = vcombine.high %v7236_v21, %v7236_v21 }
 0x158   : > { %v1183_v60 = vrot.slane %v1182_v9, 2  ;;  %v1179_v45 = vmax.f32 %v1177_v48, %v1178_v49  ;;  %v1193_v25 = vmax.f32 %v6869_v1, %v8337_v22  ;;  %v872_v53 = vrot.slane %v7236_v21, %v6711_v31 }
 0x159   : > { %v1158_v30 = vmax.f32 %v1156_v20, %v1157_v6  ;;  %v1200_v1 = vmax.f32 %v6871_v36, %v1199_v8  ;;  %v829_v47 = vcombine.high %v821_v23, %v821_v23  ;;  %v1495_v61 = vsel %vm1046_vm1, %v821_v23, -inf }
 0x15a   : > { %v1184_v51 = vmax.f32 %v1182_v9, %v1183_v60  ;;  %v2060_v42 = vsel %vm1725_vm3, %v1179_v45, %v2059_v12  ;;  %v828_v9 = vrot.slane %v814_v35, %v6711_v31  ;;  %v1496_v10 = vrot.slane %v1495_v61, 4 }
 0x15b   : > { %v7255_v48 = vsel %vm1727_vm4, %v1158_v30, %v1977_v27  ;;  %v879_v39 = vrot.slane %v865_v18, %v6711_v31  ;;  %v880_v20 = vcombine.high %v872_v53, %v872_v53  ;;  %v1502_v36 = vsel %vm1046_vm1, %v829_v47, -inf }
 0x15c   : > { %v1185_v46 = vrot.slane %v1184_v51, 1  ;;  %8338 = vst [vmem:[#allocation43_spill] sm:$0xff] %v7255_v48  ;;  %1979 = vrot.lane.b32.xlu1 %v7255_v48, %s6603_s29  ;;  %v830_v12 = vcombine.high %v828_v9, %v828_v9  ;;  %v1509_v60 = vsel %vm1046_vm1, %v828_v9, -inf  ;;  %v1497_v6 = vmax.f32 %v1495_v61, %v1496_v10 }
 0x15d   : > { %v1503_v45 = vrot.slane %v1502_v36, 4  ;;  %v1510_v22 = vrot.slane %v1509_v60, 4  ;;  %v881_v8 = vcombine.high %v879_v39, %v879_v39  ;;  %v1579_v23 = vsel %vm1046_vm1, %v872_v53, -inf }
 0x15e   : > { %v1186_v49 = vmax.f32 %v1184_v51, %v1185_v46  ;;  %v7266_v35 = vsel %vm1046_vm1, %v830_v12, -inf  ;;  %v1586_v18 = vsel %vm1046_vm1, %v880_v20, -inf  ;;  %v1498_v51 = vrot.slane %v1497_v6, 2 }
 0x15f   : > { %v1504_v30 = vmax.f32 %v1502_v36, %v1503_v45  ;;  %v7272_v46 = vmax.f32 %v1509_v60, %v1510_v22  ;;  %v1580_v47 = vrot.slane %v1579_v23, 4  ;;  %v1587_v61 = vrot.slane %v1586_v18, 4 }
 0x160   : > { %v7263_v27 = vsel %vm1727_vm4, %v1186_v49, %v2060_v42  ;;  %v1593_v42 = vsel %vm1046_vm1, %v879_v39, -inf  ;;  %v7277_v10 = vsel %vm1046_vm1, %v881_v8, -inf  ;;  %v7279_v49 = vmax.f32 %v1497_v6, %v1498_v51 }
 0x161   : > { %8339 = vst [vmem:[#allocation44_spill] sm:$0xff] %v7263_v27  ;;  %2062 = vrot.lane.b32.xlu0 %v7263_v27, %s6603_s29  ;;  %v1505_v53 = vrot.slane %v1504_v30, 2  ;;  %v1594_v12 = vrot.slane %v1593_v42, 4  ;;  %v1581_v32 = vmax.f32 %v1579_v23, %v1580_v47  ;;  %v1588_v56 = vmax.f32 %v1586_v18, %v1587_v61 }
 0x162   : > { %v8340_v60 = vrot.slane %v6866_v44, 2  ;;  %v8341_v6 = vrot.slane %v6847_v57, 4  ;;  %v2142_v18 = vsel %vm1723_vm2, %v1200_v1, %v1193_v25  ;;  %v8344_v1 = vrot.slane %v6920_v59, 4 }
 0x163   : > { %v7287_v39 = vmax.f32 %v1504_v30, %v1505_v53  ;;  %v7289_v8 = vmax.f32 %v1593_v42, %v1594_v12  ;;  %v1582_v9 = vrot.slane %v1581_v32, 2  ;;  %v1589_v20 = vrot.slane %v1588_v56, 2 }
 0x164   : > { %v1205_v45 = vmax.f32 %v6866_v44, %v8340_v60  ;;  %v1210_v51 = vmax.f32 %v6847_v57, %v8341_v6  ;;  %v8342_v44 = vrot.slane %v6940_v37, 1  ;;  %v1227_v30 = vrot.slane %v6953_v29, 1 }
 0x165   : > { %v7300_v42 = vmax.f32 %v1581_v32, %v1582_v9  ;;  %v7302_v53 = vmax.f32 %v1588_v56, %v1589_v20  ;;  %v8343_v57 = vrot.slane %v6931_v2, 2  ;;  %v1238_v47 = vmax.f32 %v6920_v59, %v8344_v1 }
 0x166   : > { %v1206_v23 = vrot.slane %v1205_v45, 1  ;;  %v1211_v61 = vrot.slane %v1210_v51, 2  ;;  %v1221_v60 = vmax.f32 %v6940_v37, %v8342_v44  ;;  %v1228_v25 = vmax.f32 %v6953_v29, %v1227_v30  ;;  %v7314_v37 = vld [vmem:[%s8206_s2] ss:$0 sm:$0xff] }
 0x167   : > { %v1233_v6 = vmax.f32 %v6931_v2, %v8343_v57  ;;  %v7318_v56 = vadd.f32 %v7314_v37, %v6804_v52  ;;  %v7324_v29 = vadd.f32 %v7314_v37, %v6824_v5  ;;  %v1239_v59 = vrot.slane %v1238_v47, 2 }
 0x168   : > { %v1207_v12 = vmax.f32 %v1205_v45, %v1206_v23  ;;  %v1212_v36 = vmax.f32 %v1210_v51, %v1211_v61  ;;  %v2225_v45 = vsel %vm1723_vm2, %v1228_v25, %v1221_v60 }
 0x169   : > { %8345 = vst [vmem:[#allocation45_spill] sm:$0xff] %v7318_v56  ;;  %v1234_v9 = vrot.slane %v1233_v6, 1  ;;  %8346 = vst [vmem:[#allocation46_spill] sm:$0xff] %v7324_v29  ;;  %v848_v51 = vcombine.high %v7318_v56, %v7318_v56  ;;  %v855_v52 = vrot.slane %v7318_v56, %v6711_v31  ;;  %v899_v61 = vcombine.high %v7324_v29, %v7324_v29 }
 0x16a   : > { %v2143_v2 = vsel %vm1725_vm3, %v1207_v12, %v2142_v18  ;;  %v1213_v20 = vrot.slane %v1212_v36, 1  ;;  %v906_v18 = vrot.slane %v7324_v29, %v6711_v31  ;;  %v1240_v5 = vmax.f32 %v1238_v47, %v1239_v59 }
 0x16b   : > { %v1235_v23 = vmax.f32 %v1233_v6, %v1234_v9  ;;  %v862_v30 = vrot.slane %v848_v51, %v6711_v31  ;;  %v8347_v12 = vrot.slane %v6922_v63, 1  ;;  %v863_v6 = vcombine.high %v855_v52, %v855_v52 }
 0x16c   : > { %v1214_v44 = vmax.f32 %v1212_v36, %v1213_v20  ;;  %v1551_v25 = vsel %vm1046_vm1, %v855_v52, -inf  ;;  %v913_v1 = vrot.slane %v899_v61, %v6711_v31  ;;  %v1241_v32 = vrot.slane %v1240_v5, 1 }
 0x16d   : > { %v1249_v60 = vmax.f32 %v6922_v63, %v8347_v12  ;;  %v2226_v57 = vsel %vm1725_vm3, %v1235_v23, %v2225_v45  ;;  %v864_v22 = vcombine.high %v862_v30, %v862_v30  ;;  %v1552_v36 = vrot.slane %v1551_v25, 4 }
 0x16e   : > { %v7343_v9 = vsel %vm1727_vm4, %v1214_v44, %v2143_v2  ;;  %v1558_v47 = vsel %vm1046_vm1, %v863_v6, -inf  ;;  %v1565_v63 = vsel %vm1046_vm1, %v862_v30, -inf  ;;  %v914_v20 = vcombine.high %v906_v18, %v906_v18 }
 0x16f   : > { %8348 = vst [vmem:[#allocation47_spill] sm:$0xff] %v7343_v9  ;;  %2145 = vrot.lane.b32.xlu1 %v7343_v9, %s6603_s29  ;;  %v915_v59 = vcombine.high %v913_v1, %v913_v1  ;;  %v1242_v45 = vmax.f32 %v1240_v5, %v1241_v32  ;;  %v1553_v51 = vmax.f32 %v1551_v25, %v1552_v36  ;;  %v1559_v23 = vrot.slane %v1558_v47, 4  ;;  %v8352_v32 = vld [vmem:[#allocation15_spill] sm:$0xff] }
 0x170   : > { %v1566_v52 = vrot.slane %v1565_v63, 4  ;;  %v7350_v61 = vsel %vm1046_vm1, %v864_v22, -inf  ;;  %v1635_v2 = vsel %vm1046_vm1, %v906_v18, -inf  ;;  %v1642_v44 = vsel %vm1046_vm1, %v914_v20, -inf }
 0x171   : > { %v1649_v12 = vsel %vm1046_vm1, %v913_v1, -inf  ;;  %v7356_v29 = vsel %vm1727_vm4, %v1242_v45, %v2226_v57  ;;  %v1554_v6 = vrot.slane %v1553_v51, 2  ;;  %v1560_v30 = vmax.f32 %v1558_v47, %v1559_v23  ;;  %v8358_v23 = vld [vmem:[#allocation25_spill] sm:$0xff] }
 0x172   : > { %8349 = vst [vmem:[#allocation48_spill] sm:$0xff] %v7356_v29  ;;  %v7358_v21 = vmax.f32 %v1565_v63, %v1566_v52  ;;  %2228 = vrot.lane.b32.xlu0 %v7356_v29, %s6603_s29  ;;  %v1636_v22 = vrot.slane %v1635_v2, 4  ;;  %v1643_v5 = vrot.slane %v1642_v44, 4  ;;  %v1650_v25 = vrot.slane %v1649_v12, 4 }
 0x173   : > { %v7363_v18 = vmax.f32 %v1553_v51, %v1554_v6  ;;  %v1561_v36 = vrot.slane %v1560_v30, 2  ;;  %v7367_v57 = vsel %vm1046_vm1, %v915_v59, -inf  ;;  %v1255_v56 = vrot.slane %v8352_v32, 1  ;;  %v8353_v51 = vld [vmem:[#allocation14_spill] sm:$0xff] }
 0x174   : > { %8350 = vst [vmem:[#allocation49_spill] sm:$0xff] %v7367_v57  ;;  %v1637_v20 = vmax.f32 %v1635_v2, %v1636_v22  ;;  %v1644_v47 = vmax.f32 %v1642_v44, %v1643_v5  ;;  %v7369_v63 = vmax.f32 %v1649_v12, %v1650_v25  ;;  %v8354_v6 = vrot.slane %v8353_v51, 2  ;;  %v8355_v2 = vld [vmem:[#allocation13_spill] sm:$0xff] }
 0x175   : > { %v7373_v52 = vmax.f32 %v1560_v30, %v1561_v36  ;;  %v8356_v44 = vrot.slane %v8355_v2, 4  ;;  %v1256_v22 = vmax.f32 %v8352_v32, %v1255_v56  ;;  %v8357_v30 = vrot.slane %v6995_v58, 1  ;;  %v8360_v32 = vld [vmem:[#allocation23_spill] sm:$0xff] }
 0x176   : > { %8351 = vst [vmem:[#allocation50_spill] sm:$0xff] %v7369_v63  ;;  %v1261_v26 = vmax.f32 %v8353_v51, %v8354_v6  ;;  %v1638_v1 = vrot.slane %v1637_v20, 2  ;;  %v1645_v29 = vrot.slane %v1644_v47, 2  ;;  %v1283_v36 = vrot.slane %v7004_v4, 1 }
 0x177   : > { %v1266_v12 = vmax.f32 %v8355_v2, %v8356_v44  ;;  %v1277_v25 = vmax.f32 %v6995_v58, %v8357_v30  ;;  %v8359_v59 = vrot.slane %v8358_v23, 2  ;;  %v2308_v2 = vsel %vm1723_vm2, %v1256_v22, %v1249_v60  ;;  %v8364_v60 = vld [vmem:[#allocation12_spill] sm:$0xff] }
 0x178   : > { %v1262_v5 = vrot.slane %v1261_v26, 1  ;;  %v7388_v45 = vmax.f32 %v1637_v20, %v1638_v1  ;;  %v7390_v51 = vmax.f32 %v1644_v47, %v1645_v29  ;;  %v1284_v56 = vmax.f32 %v7004_v4, %v1283_v36  ;;  %v8362_v29 = vld [vmem:[#allocation10_spill] sm:$0xff] }
 0x179   : > { %v1267_v6 = vrot.slane %v1266_v12, 2  ;;  %v1289_v9 = vmax.f32 %v8358_v23, %v8359_v59  ;;  %v8361_v44 = vrot.slane %v8360_v32, 4  ;;  %v7403_v47 = vadd.f32 %v7314_v37, %v8362_v29 }
 0x17a   : > { %v1263_v27 = vmax.f32 %v1261_v26, %v1262_v5  ;;  %v2391_v26 = vsel %vm1723_vm2, %v1284_v56, %v1277_v25  ;;  %v7409_v4 = vadd.f32 %v7314_v37, %v8364_v60  ;;  %v8366_v25 = vld [vmem:[#allocation22_spill] sm:$0xff] }
 0x17b   : > { %v1294_v58 = vmax.f32 %v8360_v32, %v8361_v44  ;;  %v1268_v1 = vmax.f32 %v1266_v12, %v1267_v6  ;;  %v1290_v20 = vrot.slane %v1289_v9, 1  ;;  %8363 = vst [vmem:[#allocation15_spill] sm:$0xff] %v7403_v47  ;;  %v882_v5 = vcombine.high %v7403_v47, %v7403_v47 }
 0x17c   : > { %v2309_v48 = vsel %vm1725_vm3, %v1263_v27, %v2308_v2  ;;  %8365 = vst [vmem:[#allocation14_spill] sm:$0xff] %v7409_v4  ;;  %v889_v12 = vrot.slane %v7403_v47, %v6711_v31  ;;  %v933_v6 = vcombine.high %v7409_v4, %v7409_v4  ;;  %v940_v27 = vrot.slane %v7409_v4, %v6711_v31 }
 0x17d   : > { %v1295_v23 = vrot.slane %v1294_v58, 2  ;;  %v1269_v59 = vrot.slane %v1268_v1, 1  ;;  %v1291_v22 = vmax.f32 %v1289_v9, %v1290_v20  ;;  %v8367_v2 = vrot.slane %v8366_v25, 1 }
 0x17e   : > { %v896_v44 = vrot.slane %v882_v5, %v6711_v31  ;;  %v897_v20 = vcombine.high %v889_v12, %v889_v12  ;;  %v1607_v60 = vsel %vm1046_vm1, %v889_v12, -inf }
 0x17f   : > { %v1296_v36 = vmax.f32 %v1294_v58, %v1295_v23  ;;  %v1305_v56 = vmax.f32 %v8366_v25, %v8367_v2  ;;  %v1270_v32 = vmax.f32 %v1268_v1, %v1269_v59  ;;  %v2392_v9 = vsel %vm1725_vm3, %v1291_v22, %v2391_v26 }
 0x180   : > { %v947_v58 = vrot.slane %v933_v6, %v6711_v31  ;;  %v948_v23 = vcombine.high %v940_v27, %v940_v27  ;;  %v898_v4 = vcombine.high %v896_v44, %v896_v44  ;;  %v1608_v47 = vrot.slane %v1607_v60, 4 }
 0x181   : > { %v1297_v29 = vrot.slane %v1296_v36, 1  ;;  %v7427_v30 = vsel %vm1727_vm4, %v1270_v32, %v2309_v48  ;;  %v1614_v40 = vsel %vm1046_vm1, %v897_v20, -inf  ;;  %v1621_v59 = vsel %vm1046_vm1, %v896_v44, -inf }
 0x182   : > { %8368 = vst [vmem:[#allocation13_spill] sm:$0xff] %v7427_v30  ;;  %2311 = vrot.lane.b32.xlu1 %v7427_v30, %s6603_s29  ;;  %v1615_v26 = vrot.slane %v1614_v40, 4  ;;  %v949_v22 = vcombine.high %v947_v58, %v947_v58  ;;  %v1609_v5 = vmax.f32 %v1607_v60, %v1608_v47  ;;  %v1622_v12 = vrot.slane %v1621_v59, 4 }
 0x183   : > { %v1298_v1 = vmax.f32 %v1296_v36, %v1297_v29  ;;  %v7434_v6 = vsel %vm1046_vm1, %v898_v4, -inf  ;;  %v1691_v48 = vsel %vm1046_vm1, %v940_v27, -inf  ;;  %v1698_v47 = vsel %vm1046_vm1, %v948_v23, -inf }
 0x184   : > { %v1616_v2 = vmax.f32 %v1614_v40, %v1615_v26  ;;  %v1692_v20 = vrot.slane %v1691_v48, 4  ;;  %v1610_v36 = vrot.slane %v1609_v5, 2  ;;  %v7443_v44 = vmax.f32 %v1621_v59, %v1622_v12  ;;  %v8371_v26 = vld [vmem:[#allocation24_spill] sm:$0xff] }
 0x185   : > { %v7438_v25 = vsel %vm1727_vm4, %v1298_v1, %v2392_v9  ;;  %v1705_v4 = vsel %vm1046_vm1, %v947_v58, -inf  ;;  %v1699_v27 = vrot.slane %v1698_v47, 4  ;;  %v7451_v1 = vsel %vm1046_vm1, %v949_v22, -inf  ;;  %v8383_v58 = vld [vmem:[#allocation21_spill] sm:$0xff] }
 0x186   : > { %8369 = vst [vmem:[#allocation25_spill] sm:$0xff] %v7438_v25  ;;  %2394 = vrot.lane.b32.xlu0 %v7438_v25, %s6603_s29  ;;  %v1617_v29 = vrot.slane %v1616_v2, 2  ;;  %v1693_v60 = vmax.f32 %v1691_v48, %v1692_v20  ;;  %v1706_v30 = vrot.slane %v1705_v4, 4  ;;  %v7447_v9 = vmax.f32 %v1609_v5, %v1610_v36  ;;  %8370 = vst [vmem:[#allocation23_spill] sm:$0xff] %v7451_v1  ;;  %v8373_v20 = vld [vmem:[#allocation20_spill] sm:$0xff] }
 0x187   : > { %v1311_v32 = vrot.slane %v8371_v26, 1  ;;  %v1700_v12 = vmax.f32 %v1698_v47, %v1699_v27  ;;  %v8374_v36 = vrot.slane %v8373_v20, 2  ;;  %v8378_v27 = vrot.slane %v7037_v34, 1 }
 0x188   : > { %v7454_v25 = vmax.f32 %v1616_v2, %v1617_v29  ;;  %v1694_v59 = vrot.slane %v1693_v60, 2  ;;  %v7456_v23 = vmax.f32 %v1705_v4, %v1706_v30  ;;  %v8376_v29 = vld [vmem:[#allocation19_spill] sm:$0xff] }
 0x189   : > { %v1312_v5 = vmax.f32 %v8371_v26, %v1311_v32  ;;  %v1317_v40 = vmax.f32 %v8373_v20, %v8374_v36  ;;  %v1701_v57 = vrot.slane %v1700_v12, 2  ;;  %v8377_v63 = vrot.slane %v8376_v29, 4 }
 0x18a   : > { %8372 = vst [vmem:[#allocation10_spill] sm:$0xff] %v7456_v23  ;;  %v7464_v22 = vmax.f32 %v1693_v60, %v1694_v59  ;;  %v1333_v32 = vmax.f32 %v7037_v34, %v8378_v27  ;;  %v1339_v26 = vrot.slane %v7046_v7, 1  ;;  %v8380_v36 = vrot.slane %v7032_v54, 2  ;;  %v8387_v23 = vld [vmem:[#allocation30_spill] sm:$0xff] }
 0x18b   : > { %v1322_v30 = vmax.f32 %v8376_v29, %v8377_v63  ;;  %v1318_v47 = vrot.slane %v1317_v40, 1  ;;  %v2474_v4 = vsel %vm1723_vm2, %v1312_v5, %v1305_v56  ;;  %v7476_v60 = vmax.f32 %v1700_v12, %v1701_v57  ;;  %v8381_v29 = vld [vmem:[#allocation31_spill] sm:$0xff]  ;;  %v8385_v57 = vld [vmem:[#allocation29_spill] sm:$0xff] }
 0x18c   : > { %8375 = vst [vmem:[#allocation12_spill] sm:$0xff] %v7464_v22  ;;  %v1345_v48 = vmax.f32 %v7032_v54, %v8380_v36  ;;  %v1340_v63 = vmax.f32 %v7046_v7, %v1339_v26  ;;  %v8382_v56 = vrot.slane %v8381_v29, 4  ;;  %v7487_v34 = vadd.f32 %v7314_v37, %v8383_v58 }
 0x18d   : > { %8379 = vst [vmem:[#allocation22_spill] sm:$0xff] %v7476_v60  ;;  %v1323_v59 = vrot.slane %v1322_v30, 2  ;;  %v1319_v2 = vmax.f32 %v1317_v40, %v1318_v47  ;;  %v8386_v12 = vrot.slane %v8385_v57, 1  ;;  %v1367_v60 = vrot.slane %v8387_v23, 1 }
 0x18e   : > { %v1350_v5 = vmax.f32 %v8381_v29, %v8382_v56  ;;  %8384 = vst [vmem:[#allocation24_spill] sm:$0xff] %v7487_v34  ;;  %v1346_v20 = vrot.slane %v1345_v48, 1  ;;  %v2557_v7 = vsel %vm1723_vm2, %v1340_v63, %v1333_v32  ;;  %v916_v47 = vcombine.high %v7487_v34, %v7487_v34  ;;  %v8388_v29 = vld [vmem:[#allocation27_spill] sm:$0xff] }
 0x18f   : > { %v1324_v27 = vmax.f32 %v1322_v30, %v1323_v59  ;;  %v1361_v1 = vmax.f32 %v8385_v57, %v8386_v12  ;;  %v2475_v54 = vsel %vm1725_vm3, %v1319_v2, %v2474_v4  ;;  %v923_v37 = vrot.slane %v7487_v34, %v6711_v31  ;;  %v8390_v4 = vld [vmem:[#allocation26_spill] sm:$0xff] }
 0x190   : > { %v1351_v40 = vrot.slane %v1350_v5, 2  ;;  %v1347_v36 = vmax.f32 %v1345_v48, %v1346_v20  ;;  %v1368_v58 = vmax.f32 %v8387_v23, %v1367_v60  ;;  %v930_v59 = vrot.slane %v916_v47, %v6711_v31 }
 0x191   : > { %v1325_v26 = vrot.slane %v1324_v27, 1  ;;  %v8389_v56 = vrot.slane %v8388_v29, 2  ;;  %v8391_v57 = vrot.slane %v8390_v4, 4  ;;  %v931_v48 = vcombine.high %v923_v37, %v923_v37 }
 0x192   : > { %v1352_v30 = vmax.f32 %v1350_v5, %v1351_v40  ;;  %v2558_v12 = vsel %vm1725_vm3, %v1347_v36, %v2557_v7  ;;  %v1663_v20 = vsel %vm1046_vm1, %v923_v37, -inf  ;;  %v932_v22 = vcombine.high %v930_v59, %v930_v59 }
 0x193   : > { %v1373_v2 = vmax.f32 %v8388_v29, %v8389_v56  ;;  %v1378_v32 = vmax.f32 %v8390_v4, %v8391_v57  ;;  %v1326_v63 = vmax.f32 %v1324_v27, %v1325_v26  ;;  %v1664_v23 = vrot.slane %v1663_v20, 4 }
 0x194   : > { %v1353_v34 = vrot.slane %v1352_v30, 1  ;;  %v1677_v60 = vsel %vm1046_vm1, %v930_v59, -inf  ;;  %v1670_v5 = vsel %vm1046_vm1, %v931_v48, -inf  ;;  %v7517_v36 = vsel %vm1046_vm1, %v932_v22, -inf }
 0x195   : > { %v7511_v31 = vsel %vm1727_vm4, %v1326_v63, %v2475_v54  ;;  %v1678_v40 = vrot.slane %v1677_v60, 4  ;;  %v1374_v47 = vrot.slane %v1373_v2, 1  ;;  %v1665_v7 = vmax.f32 %v1663_v20, %v1664_v23 }
 0x196   : > { %2477 = vrot.lane.b32.xlu1 %v7511_v31, %s6603_s29  ;;  %v1354_v27 = vmax.f32 %v1352_v30, %v1353_v34  ;;  %v1671_v26 = vrot.slane %v1670_v5, 4  ;;  %v1379_v54 = vrot.slane %v1378_v32, 2  ;;  %v2640_v63 = vsel %vm1723_vm2, %v1368_v58, %v1361_v1 }
 0x197   : > { %v7519_v37 = vmax.f32 %v1677_v60, %v1678_v40  ;;  %v1375_v29 = vmax.f32 %v1373_v2, %v1374_v47  ;;  %v1666_v4 = vrot.slane %v1665_v7, 2  ;;  %v8392_v48 = vrot.slane %v7097_v28, 1 }
 0x198   : > { %v7523_v56 = vsel %vm1727_vm4, %v1354_v27, %v2558_v12  ;;  %v1672_v57 = vmax.f32 %v1670_v5, %v1671_v26  ;;  %v1380_v22 = vmax.f32 %v1378_v32, %v1379_v54  ;;  %v1395_v23 = vrot.slane %v7104_v15, 1 }
 0x199   : > { %2560 = vrot.lane.b32.xlu0 %v7523_v56, %s6603_s29  ;;  %v1680_v34 = vrot.slane %v7519_v37, 2  ;;  %v2641_v30 = vsel %vm1725_vm3, %v1375_v29, %v2640_v63  ;;  %v1389_v2 = vmax.f32 %v7097_v28, %v8392_v48  ;;  %v7533_v20 = vmax.f32 %v1665_v7, %v1666_v4  ;;  %v8396_v63 = vld [vmem:[#allocation33_spill] sm:$0xff] }
 0x19a   : > { %v1673_v12 = vrot.slane %v1672_v57, 2  ;;  %v8393_v60 = vrot.slane %v7091_v41, 2  ;;  %v1381_v58 = vrot.slane %v1380_v22, 1  ;;  %v8394_v5 = vrot.slane %v7085_v24, 4 }
 0x19b   : > { %v8395_v40 = vrot.slane %v7065_v19, 1  ;;  %v1423_v28 = vrot.slane %v7076_v11, 1  ;;  %v1668_v27 = vrot.slane %v7533_v20, 1  ;;  %v1396_v26 = vmax.f32 %v7104_v15, %v1395_v23 }
 0x19c   : > { %v1401_v1 = vmax.f32 %v7091_v41, %v8393_v60  ;;  %v1406_v32 = vmax.f32 %v7085_v24, %v8394_v5  ;;  %v7547_v7 = vmax.f32 %v1672_v57, %v1673_v12  ;;  %v1382_v54 = vmax.f32 %v1380_v22, %v1381_v58  ;;  %v8398_v5 = vld [vmem:[#allocation32_spill] sm:$0xff] }
 0x19d   : > { %v1417_v47 = vmax.f32 %v7065_v19, %v8395_v40  ;;  %v1424_v4 = vmax.f32 %v7076_v11, %v1423_v28  ;;  %v8397_v48 = vrot.slane %v8396_v63, 2  ;;  %v2723_v19 = vsel %vm1723_vm2, %v1396_v26, %v1389_v2 }
 0x19e   : > { %v1402_v29 = vrot.slane %v1401_v1, 1  ;;  %v1407_v41 = vrot.slane %v1406_v32, 2  ;;  %v8399_v40 = vrot.slane %v8398_v5, 4  ;;  %v8400_v57 = vrot.slane %v7187_v16, 1 }
 0x19f   : > { %v1429_v24 = vmax.f32 %v8396_v63, %v8397_v48  ;;  %v7562_v22 = vsel %vm1727_vm4, %v1382_v54, %v2641_v30  ;;  %v2806_v23 = vsel %vm1723_vm2, %v1424_v4, %v1417_v47  ;;  %v1451_v58 = vrot.slane %v7197_v14, 1 }
 0x1a0   : > { %v1403_v60 = vmax.f32 %v1401_v1, %v1402_v29  ;;  %v1434_v59 = vmax.f32 %v8398_v5, %v8399_v40  ;;  %v1445_v15 = vmax.f32 %v7187_v16, %v8400_v57  ;;  %v1408_v12 = vmax.f32 %v1406_v32, %v1407_v41  ;;  %2643 = vrot.lane.b32.xlu1 %v7562_v22, %s6603_s29 }
 0x1a1   : > { %v1430_v11 = vrot.slane %v1429_v24, 1  ;;  %v8401_v28 = vrot.slane %v7179_v17, 2  ;;  %v8402_v30 = vrot.slane %v7172_v13, 4  ;;  %v8403_v47 = vrot.slane %v7125_v43, 1 }
 0x1a2   : > { %v2724_v2 = vsel %vm1725_vm3, %v1403_v60, %v2723_v19  ;;  %v1435_v1 = vrot.slane %v1434_v59, 2  ;;  %v1409_v16 = vrot.slane %v1408_v12, 1  ;;  %v1452_v4 = vmax.f32 %v7197_v14, %v1451_v58 }
 0x1a3   : > { %v1457_v26 = vmax.f32 %v7179_v17, %v8401_v28  ;;  %v1431_v29 = vmax.f32 %v1429_v24, %v1430_v11  ;;  %v1462_v32 = vmax.f32 %v7172_v13, %v8402_v30  ;;  %v1473_v54 = vmax.f32 %v7125_v43, %v8403_v47 }
 0x1a4   : > { %v1436_v41 = vmax.f32 %v1434_v59, %v1435_v1  ;;  %v1479_v48 = vrot.slane %v7134_v0, 1  ;;  %v1410_v60 = vmax.f32 %v1408_v12, %v1409_v16  ;;  %v8404_v24 = vrot.slane %v7117_v55, 2 }
 0x1a5   : > { %v1458_v63 = vrot.slane %v1457_v26, 1  ;;  %v2807_v19 = vsel %vm1725_vm3, %v1431_v29, %v2806_v23  ;;  %v1463_v17 = vrot.slane %v1462_v32, 2  ;;  %v2889_v57 = vsel %vm1723_vm2, %v1452_v4, %v1445_v15 }
 0x1a6   : > { %v1485_v5 = vmax.f32 %v7117_v55, %v8404_v24  ;;  %v1437_v40 = vrot.slane %v1436_v41, 1  ;;  %v1480_v43 = vmax.f32 %v7134_v0, %v1479_v48  ;;  %v7587_v59 = vsel %vm1727_vm4, %v1410_v60, %v2724_v2 }
 0x1a7   : > { %v1459_v13 = vmax.f32 %v1457_v26, %v1458_v63  ;;  %v1464_v14 = vmax.f32 %v1462_v32, %v1463_v17  ;;  %v8405_v12 = vrot.slane %v7110_v50, 4  ;;  %2726 = vrot.lane.b32.xlu0 %v7587_v59, %s6603_s29  ;;  %v8406_v15 = vrot.slane %v7279_v49, 1 }
 0x1a8   : > { %v1486_v11 = vrot.slane %v1485_v5, 1  ;;  %v1438_v1 = vmax.f32 %v1436_v41, %v1437_v40  ;;  %v2972_v58 = vsel %vm1723_vm2, %v1480_v43, %v1473_v54  ;;  %v1507_v16 = vrot.slane %v7287_v39, 1 }
 0x1a9   : > { %v1490_v23 = vmax.f32 %v7110_v50, %v8405_v12  ;;  %v2890_v55 = vsel %vm1725_vm3, %v1459_v13, %v2889_v57  ;;  %v1501_v0 = vmax.f32 %v7279_v49, %v8406_v15  ;;  %v1465_v2 = vrot.slane %v1464_v14, 1 }
 0x1aa   : > { %v1487_v28 = vmax.f32 %v1485_v5, %v1486_v11  ;;  %v7601_v29 = vsel %vm1727_vm4, %v1438_v1, %v2807_v19  ;;  %v8407_v50 = vrot.slane %v7272_v46, 2  ;;  %v8408_v32 = vrot.slane %v7266_v35, 4 }
 0x1ab   : > { %v1491_v26 = vrot.slane %v1490_v23, 2  ;;  %v8409_v54 = vrot.slane %v7215_v33, 1  ;;  %2809 = vrot.lane.b32.xlu1 %v7601_v29, %s6603_s29  ;;  %v1466_v41 = vmax.f32 %v1464_v14, %v1465_v2  ;;  %v1508_v48 = vmax.f32 %v7287_v39, %v1507_v16 }
 0x1ac   : > { %v1513_v30 = vmax.f32 %v7272_v46, %v8407_v50  ;;  %v1518_v47 = vmax.f32 %v7266_v35, %v8408_v32  ;;  %v2973_v63 = vsel %vm1725_vm3, %v1487_v28, %v2972_v58  ;;  %v1535_v46 = vrot.slane %v7221_v62, 1 }
 0x1ad   : > { %v1529_v49 = vmax.f32 %v7215_v33, %v8409_v54  ;;  %v1492_v4 = vmax.f32 %v1490_v23, %v1491_v26  ;;  %v8410_v17 = vrot.slane %v7200_v3, 2  ;;  %v7621_v24 = vsel %vm1727_vm4, %v1466_v41, %v2890_v55 }
 0x1ae   : > { %v1514_v60 = vrot.slane %v1513_v30, 1  ;;  %v1519_v19 = vrot.slane %v1518_v47, 2  ;;  %v3055_v5 = vsel %vm1723_vm2, %v1508_v48, %v1501_v0  ;;  %v8411_v40 = vrot.slane %v7191_v38, 4  ;;  %2892 = vrot.lane.b32.xlu0 %v7621_v24, %s6603_s29 }
 0x1af   : > { %v1541_v35 = vmax.f32 %v7200_v3, %v8410_v17  ;;  %v1493_v33 = vrot.slane %v1492_v4, 1  ;;  %v1536_v43 = vmax.f32 %v7221_v62, %v1535_v46  ;;  %v8412_v12 = vrot.slane %v7363_v18, 1 }
 0x1b0   : > { %v1546_v13 = vmax.f32 %v7191_v38, %v8411_v40  ;;  %v1515_v39 = vmax.f32 %v1513_v30, %v1514_v60  ;;  %v1520_v57 = vmax.f32 %v1518_v47, %v1519_v19  ;;  %v1563_v1 = vrot.slane %v7373_v52, 1 }
 0x1b1   : > { %v1542_v14 = vrot.slane %v1541_v35, 1  ;;  %v1494_v11 = vmax.f32 %v1492_v4, %v1493_v33  ;;  %v1557_v23 = vmax.f32 %v7363_v18, %v8412_v12  ;;  %v3138_v15 = vsel %vm1723_vm2, %v1536_v43, %v1529_v49 }
 0x1b2   : > { %v1547_v3 = vrot.slane %v1546_v13, 2  ;;  %v1521_v55 = vrot.slane %v1520_v57, 1  ;;  %v3056_v58 = vsel %vm1725_vm3, %v1515_v39, %v3055_v5  ;;  %v1564_v62 = vmax.f32 %v7373_v52, %v1563_v1 }
 0x1b3   : > { %v1543_v38 = vmax.f32 %v1541_v35, %v1542_v14  ;;  %v7637_v0 = vsel %vm1727_vm4, %v1494_v11, %v2973_v63  ;;  %v8413_v28 = vrot.slane %v7358_v21, 2  ;;  %v8414_v50 = vrot.slane %v7350_v61, 4 }
 0x1b4   : > { %v1548_v2 = vmax.f32 %v1546_v13, %v1547_v3  ;;  %2975 = vrot.lane.b32.xlu1 %v7637_v0, %s6603_s29  ;;  %v1522_v18 = vmax.f32 %v1520_v57, %v1521_v55  ;;  %v8415_v32 = vrot.slane %v7300_v42, 1  ;;  %v3221_v49 = vsel %vm1723_vm2, %v1564_v62, %v1557_v23 }
 0x1b5   : > { %v1569_v26 = vmax.f32 %v7358_v21, %v8413_v28  ;;  %v3139_v16 = vsel %vm1725_vm3, %v1543_v38, %v3138_v15  ;;  %v1574_v30 = vmax.f32 %v7350_v61, %v8414_v50  ;;  %v1591_v21 = vrot.slane %v7302_v53, 1  ;;  %v8424_v50 = vld [vmem:[#allocation49_spill] sm:$0xff] }
 0x1b6   : > { %v1585_v47 = vmax.f32 %v7300_v42, %v8415_v32  ;;  %v1549_v54 = vrot.slane %v1548_v2, 1  ;;  %v7655_v41 = vsel %vm1727_vm4, %v1522_v18, %v3056_v58  ;;  %v8416_v63 = vrot.slane %v7289_v8, 2 }
 0x1b7   : > { %v1570_v52 = vrot.slane %v1569_v26, 1  ;;  %v1575_v4 = vrot.slane %v1574_v30, 2  ;;  %v8417_v61 = vrot.slane %v7277_v10, 4  ;;  %3058 = vrot.lane.b32.xlu0 %v7655_v41, %s6603_s29  ;;  %v1592_v46 = vmax.f32 %v7302_v53, %v1591_v21 }
 0x1b8   : > { %v1597_v48 = vmax.f32 %v7289_v8, %v8416_v63  ;;  %v1550_v42 = vmax.f32 %v1548_v2, %v1549_v54  ;;  %v8418_v17 = vrot.slane %v7447_v9, 1  ;;  %v1619_v8 = vrot.slane %v7454_v25, 1 }
 0x1b9   : > { %v1602_v60 = vmax.f32 %v7277_v10, %v8417_v61  ;;  %v1571_v19 = vmax.f32 %v1569_v26, %v1570_v52  ;;  %v1576_v33 = vmax.f32 %v1574_v30, %v1575_v4  ;;  %v3304_v39 = vsel %vm1723_vm2, %v1592_v46, %v1585_v47  ;;  %v8422_v26 = vld [vmem:[#allocation50_spill] sm:$0xff] }
 0x1ba   : > { %v1613_v35 = vmax.f32 %v7447_v9, %v8418_v17  ;;  %v1598_v5 = vrot.slane %v1597_v48, 1  ;;  %v7671_v13 = vsel %vm1727_vm4, %v1550_v42, %v3139_v16  ;;  %v8419_v57 = vrot.slane %v7443_v44, 2  ;;  %v8427_v42 = vld [vmem:[#allocation12_spill] sm:$0xff] }
 0x1bb   : > { %v1603_v40 = vrot.slane %v1602_v60, 2  ;;  %v3222_v10 = vsel %vm1725_vm3, %v1571_v19, %v3221_v49  ;;  %3141 = vrot.lane.b32.xlu1 %v7671_v13, %s6603_s29  ;;  %v1577_v9 = vrot.slane %v1576_v33, 1  ;;  %v1620_v11 = vmax.f32 %v7454_v25, %v1619_v8 }
 0x1bc   : > { %v1625_v53 = vmax.f32 %v7443_v44, %v8419_v57  ;;  %v1599_v43 = vmax.f32 %v1597_v48, %v1598_v5  ;;  %v8420_v12 = vrot.slane %v7434_v6, 4  ;;  %v8421_v1 = vrot.slane %v7388_v45, 1  ;;  %v8429_v5 = vld [vmem:[#allocation22_spill] sm:$0xff] }
 0x1bd   : > { %v1604_v14 = vmax.f32 %v1602_v60, %v1603_v40  ;;  %v1647_v58 = vrot.slane %v7390_v51, 1  ;;  %v1578_v44 = vmax.f32 %v1576_v33, %v1577_v9  ;;  %v3387_v2 = vsel %vm1723_vm2, %v1620_v11, %v1613_v35 }
 0x1be   : > { %v1626_v3 = vrot.slane %v1625_v53, 1  ;;  %v1630_v23 = vmax.f32 %v7434_v6, %v8420_v12  ;;  %v1641_v55 = vmax.f32 %v7388_v45, %v8421_v1  ;;  %v3305_v15 = vsel %vm1725_vm3, %v1599_v43, %v3304_v39  ;;  %v8432_v12 = vld [vmem:[#allocation23_spill] sm:$0xff] }
 0x1bf   : > { %v1605_v38 = vrot.slane %v1604_v14, 1  ;;  %v1648_v25 = vmax.f32 %v7390_v51, %v1647_v58  ;;  %v8423_v18 = vrot.slane %v8422_v26, 2  ;;  %v7695_v16 = vsel %vm1727_vm4, %v1578_v44, %v3222_v10  ;;  %v8430_v10 = vld [vmem:[#allocation10_spill] sm:$0xff] }
 0x1c0   : > { %v1627_v62 = vmax.f32 %v1625_v53, %v1626_v3  ;;  %v1631_v28 = vrot.slane %v1630_v23, 2  ;;  %v8425_v30 = vrot.slane %v8424_v50, 4  ;;  %v1669_v47 = vmax.f32 %v7533_v20, %v1668_v27  ;;  %3224 = vrot.lane.b32.xlu0 %v7695_v16, %s6603_s29  ;;  %v1730_v53 = vpop.permute.xlu0 %1729 }
 0x1c1   : > { %v1653_v6 = vmax.f32 %v8422_v26, %v8423_v18  ;;  %v1606_v45 = vmax.f32 %v1604_v14, %v1605_v38  ;;  %v3470_v49 = vsel %vm1723_vm2, %v1648_v25, %v1641_v55  ;;  %v1675_v63 = vrot.slane %v7547_v7, 1 }
 0x1c2   : > { %v1658_v32 = vmax.f32 %v8424_v50, %v8425_v30  ;;  %v1632_v51 = vmax.f32 %v1630_v23, %v1631_v28  ;;  %v3388_v54 = vsel %vm1725_vm3, %v1627_v62, %v3387_v2  ;;  %v1681_v48 = vmax.f32 %v7519_v37, %v1680_v34  ;;  %v8434_v50 = vld [vmem:[#allocation3_spill] sm:$0xff] }
 0x1c3   : > { %v1654_v52 = vrot.slane %v1653_v6, 1  ;;  %v7708_v21 = vsel %vm1727_vm4, %v1606_v45, %v3305_v15  ;;  %v8426_v61 = vrot.slane %v7517_v36, 4  ;;  %v8428_v19 = vrot.slane %v8427_v42, 1 }
 0x1c4   : > { %v1659_v4 = vrot.slane %v1658_v32, 2  ;;  %3307 = vrot.lane.b32.xlu1 %v7708_v21, %s6603_s29  ;;  %v1633_v20 = vrot.slane %v1632_v51, 1  ;;  %v1676_v35 = vmax.f32 %v7547_v7, %v1675_v63  ;;  %v1682_v33 = vrot.slane %v1681_v48, 1  ;;  %v1814_v18 = vpop.permute.xlu0 %1813 }
 0x1c5   : > { %v1655_v27 = vmax.f32 %v1653_v6, %v1654_v52  ;;  %v1686_v60 = vmax.f32 %v7517_v36, %v8426_v61  ;;  %v1697_v46 = vmax.f32 %v8427_v42, %v8428_v19  ;;  %v1703_v40 = vrot.slane %v8429_v5, 1  ;;  %v8436_v52 = vld [vmem:[#allocation36_spill] sm:$0xff]  ;;  %v8443_v42 = vld [vmem:[#allocation47_spill] sm:$0xff] }
 0x1c6   : > { %v1660_v17 = vmax.f32 %v1658_v32, %v1659_v4  ;;  %v1634_v37 = vmax.f32 %v1632_v51, %v1633_v20  ;;  %v8431_v39 = vrot.slane %v8430_v10, 2  ;;  %v1683_v9 = vmax.f32 %v1681_v48, %v1682_v33  ;;  %v1897_v51 = vpop.permute.xlu1 %1896  ;;  %v8438_v4 = vld [vmem:[#allocation39_spill] sm:$0xff]  ;;  %v8439_v48 = vld [vmem:[#allocation5_spill] sm:$0xff]  ;;  %v8444_v19 = vld [vmem:[#allocation48_spill] sm:$0xff] }
 0x1c7   : > { %v3471_v34 = vsel %vm1725_vm3, %v1655_v27, %v3470_v49  ;;  %v1687_v8 = vrot.slane %v1686_v60, 2  ;;  %v3553_v43 = vsel %vm1723_vm2, %v1676_v35, %v1669_v47  ;;  %v1704_v14 = vmax.f32 %v8429_v5, %v1703_v40  ;;  %v8437_v49 = vld [vmem:[#allocation40_spill] sm:$0xff]  ;;  %v8440_v20 = vld [vmem:[#allocation43_spill] sm:$0xff]  ;;  %v8447_v35 = vld [vmem:[#allocation25_spill] sm:$0xff] }
 0x1c8   : > { %v1709_v57 = vmax.f32 %v8430_v10, %v8431_v39  ;;  %v1661_v36 = vrot.slane %v1660_v17, 1  ;;  %v7731_v7 = vsel %vm1727_vm4, %v1634_v37, %v3388_v54  ;;  %v8433_v23 = vrot.slane %v8432_v12, 4  ;;  %v8435_v54 = vld [vmem:[#allocation2_spill] sm:$0xff]  ;;  %v8441_v27 = vld [vmem:[#allocation44_spill] sm:$0xff] }
 0x1c9   : > { %v1688_v11 = vmax.f32 %v1686_v60, %v1687_v8  ;;  %3390 = vrot.lane.b32.xlu0 %v7731_v7, %s6603_s29  ;;  %v6604_v38 = vmov 0.0   ;;  %v3554_v2 = vsel %vm1725_vm3, %v1683_v9, %v3553_v43  ;;  %v3636_v26 = vsel %vm1723_vm2, %v1704_v14, %v1697_v46  ;;  %v8442_v60 = vld [vmem:[#allocation4_spill] sm:$0xff]  ;;  %v8445_v46 = vld [vmem:[#allocation7_spill] sm:$0xff]  ;;  %v8448_v40 = vld [vmem:[#allocation6_spill] sm:$0xff] }
 0x1ca   : > { %v1710_v3 = vrot.slane %v1709_v57, 1  ;;  %v1714_v1 = vmax.f32 %v8432_v12, %v8433_v23  ;;  %v1662_v55 = vmax.f32 %v1660_v17, %v1661_v36  ;;  %6300 = vmatprep.subr.mxu1 %v6604_v38  ;;  %6360 = vmatprep.subr.mxu0 %v6604_v38  ;;  %v8446_v17 = vld [vmem:[#allocation13_spill] sm:$0xff]  ;;  %v8455_v8 = vld [vmem:[#allocation34_spill] sm:$0xff]  ;;  %v8456_v39 = vld [vmem:[#allocation28_spill] sm:$0xff] }
 0x1cb   : > { %v1689_v58 = vrot.slane %v1688_v11, 1  ;;  %6301 = vmatpush3.xpose.msk.msra.mxu1 %vm1731_vm5, %v1730_v53  ;;  %6302 = vmatprep.mubr.msk.f32.mxu1 %vm6605_vm6, %v6604_v38  ;;  %v8457_v53 = vld [vmem:[#allocation37_spill] sm:$0xff]  ;;  %v8458_v9 = vld [vmem:[#allocation35_spill] sm:$0xff]  ;;  %v8462_v23 = vld [vmem:[#allocation42_spill] sm:$0xff] }
 0x1cc   : > { %v1715_v44 = vrot.slane %v1714_v1, 2  ;;  %v7741_v15 = vsel %vm1727_vm4, %v1662_v55, %v3471_v34  ;;  %v1711_v62 = vmax.f32 %v1709_v57, %v1710_v3  ;;  %6305 = vmatprep.subr.mxu1 %v6604_v38  ;;  %6362 = vmatprep.mubr.msk.f32.mxu0 %vm6605_vm6, %v6604_v38  ;;  %v8459_v14 = vld [vmem:[#allocation41_spill] sm:$0xff] }
 0x1cd   : > { %3473 = vrot.lane.b32.xlu1 %v7741_v15, %s6603_s29  ;;  %v1690_v28 = vmax.f32 %v1688_v11, %v1689_v58  ;;  %v8461_v12 = vld [vmem:[#allocation45_spill] sm:$0xff]  ;;  %v8463_v58 = vld [vmem:[#allocation15_spill] sm:$0xff] }
 0x1ce   : > { %v1716_v25 = vmax.f32 %v1714_v1, %v1715_v44  ;;  %6303 = vmatmul.mubr.msk.f32.vlgmr.msra.gmra.mrb[12].mxu1 %vm1731_vm5, %v8434_v50  ;;  %v3637_v30 = vsel %vm1725_vm3, %v1711_v62, %v3636_v26  ;;  %v1980_v63 = vpop.permute.xlu1 %1979  ;;  %v8465_v62 = vld [vmem:[#allocation24_spill] sm:$0xff]  ;;  %v8466_v26 = vld [vmem:[#allocation14_spill] sm:$0xff] }
 0x1cf   : > { %v7754_v6 = vsel %vm1727_vm4, %v1690_v28, %v3554_v2  ;;  %6306 = vmatpush3.xpose.msk.msra.mxu1 %vm1731_vm5, %v1814_v18  ;;  %6307 = vmatprep.mubr.msk.f32.mxu1 %vm6605_vm6, %v6604_v38 }
 0x1d0   : > { %v1717_v45 = vrot.slane %v1716_v25, 1  ;;  %3556 = vrot.lane.b32.xlu0 %v7754_v6, %s6603_s29  ;;  %6310 = vmatprep.subr.mxu1 %v6604_v38 }
 0x1d2   : > { %v1718_v32 = vmax.f32 %v1716_v25, %v1717_v45  ;;  %6308 = vmatmul.mubr.msk.f32.vlgmr.msra.gmra.mrb[14].mxu1 %vm1731_vm5, %v8435_v54 }
 0x1d3   : > { %6311 = vmatpush3.xpose.msk.msra.mxu1 %vm1731_vm5, %v1897_v51  ;;  %6312 = vmatprep.mubr.msk.f32.mxu1 %vm6605_vm6, %v6604_v38  ;;  %v2063_v61 = vpop.permute.xlu0 %2062 }
 0x1d4   : > { %v3638_v47 = vsel %vm1727_vm4, %v1718_v32, %v3637_v30  ;;  %3715 = vrot.lane.b32.xlu0 %v8436_v52, %s6606_s7  ;;  %6315 = vmatprep.subr.mxu1 %v6604_v38 }
 0x1d5   : > { %3639 = vrot.lane.b32.xlu1 %v3638_v47, %s6603_s29 }
 0x1d6   : > { %6313 = vmatmul.mubr.msk.f32.vlgmr.msra.gmra.mrb[16].mxu1 %vm1731_vm5, %v8439_v48 }
 0x1d7   : > { %6316 = vmatpush3.xpose.msk.msra.mxu1 %vm1731_vm5, %v1980_v63  ;;  %6317 = vmatprep.mubr.msk.f32.mxu1 %vm6605_vm6, %v6604_v38 }
 0x1d8   : > { %3870 = vrot.lane.b32.xlu0 %v8438_v4, %s6606_s7  ;;  %6320 = vmatprep.subr.mxu1 %v6604_v38 }
 0x1d9   : > { %3793 = vrot.lane.b32.xlu1 %v8437_v49, %s6606_s7 }
 0x1da   : > { %6318 = vmatmul.mubr.msk.f32.vlgmr.msra.gmra.mrb[18].mxu1 %vm1731_vm5, %v8442_v60 }
 0x1db   : > { %6321 = vmatpush3.xpose.msk.msra.mxu1 %vm1731_vm5, %v2063_v61  ;;  %6322 = vmatprep.mubr.msk.f32.mxu1 %vm6605_vm6, %v6604_v38 }
 0x1dc   : > { %4024 = vrot.lane.b32.xlu0 %v8441_v27, %s6606_s7  ;;  %6325 = vmatprep.subr.mxu1 %v6604_v38 }
 0x1dd   : > { %3947 = vrot.lane.b32.xlu1 %v8440_v20, %s6606_s7 }
 0x1de   : > { %6323 = vmatmul.mubr.msk.f32.vlgmr.msra.gmra.mrb[20].mxu1 %vm1731_vm5, %v8445_v46 }
 0x1df   : > { %6327 = vmatprep.mubr.msk.f32.mxu1 %vm6605_vm6, %v6604_v38 }
 0x1e0   : > { %4178 = vrot.lane.b32.xlu0 %v8444_v19, %s6606_s7 }
 0x1e1   : > { %4101 = vrot.lane.b32.xlu1 %v8443_v42, %s6606_s7  ;;  %v2146_v33 = vpop.permute.xlu1 %2145 }
 0x1e2   : > { %6326 = vmatpush3.xpose.msk.msra.mxu1 %vm1731_vm5, %v2146_v33 }
 0x1e3   : > { %6330 = vmatprep.subr.mxu1 %v6604_v38 }
 0x1e4   : > { %4332 = vrot.lane.b32.xlu0 %v8447_v35, %s6606_s7  ;;  %v2229_v5 = vpop.permute.xlu0 %2228 }
 0x1e5   : > { %4255 = vrot.lane.b32.xlu1 %v8446_v17, %s6606_s7  ;;  %6328 = vmatmul.mubr.msk.f32.vlgmr.msra.gmra.mrb[22].mxu1 %vm1731_vm5, %v8448_v40 }
 0x1e6   : > { %6331 = vmatpush3.xpose.msk.msra.mxu1 %vm1731_vm5, %v2229_v5  ;;  %6332 = vmatprep.mubr.msk.f32.mxu1 %vm6605_vm6, %v6604_v38 }
 0x1e7   : > { %6335 = vmatprep.subr.mxu1 %v6604_v38 }
 0x1e8   : > { %4486 = vrot.lane.b32.xlu0 %v7523_v56, %s6606_s7 }
 0x1e9   : > { %4409 = vrot.lane.b32.xlu1 %v7511_v31, %s6606_s7  ;;  %v8449_v31 = vld [vmem:[#allocation9_spill] sm:$0xff] }
 0x1ea   : > { %6333 = vmatmul.mubr.msk.f32.vlgmr.msra.gmra.mrb[24].mxu1 %vm1731_vm5, %v8449_v31 }
 0x1eb   : > { %6337 = vmatprep.mubr.msk.f32.mxu1 %vm6605_vm6, %v6604_v38 }
 0x1ec   : > { %4640 = vrot.lane.b32.xlu0 %v7587_v59, %s6606_s7  ;;  %v8450_v59 = vld [vmem:[#allocation8_spill] sm:$0xff] }
 0x1ed   : > { %4563 = vrot.lane.b32.xlu1 %v7562_v22, %s6606_s7 }
 0x1f0   : > { %4794 = vrot.lane.b32.xlu0 %v7621_v24, %s6606_s7 }
 0x1f1   : > { %4717 = vrot.lane.b32.xlu1 %v7601_v29, %s6606_s7  ;;  %v8451_v29 = vld [vmem:[#allocation16_spill] sm:$0xff] }
 0x1f4   : > { %4948 = vrot.lane.b32.xlu0 %v7655_v41, %s6606_s7  ;;  %v2312_v56 = vpop.permute.xlu1 %2311  ;;  %v8452_v41 = vld [vmem:[#allocation11_spill] sm:$0xff] }
 0x1f5   : > { %4871 = vrot.lane.b32.xlu1 %v7637_v0, %s6606_s7  ;;  %6336 = vmatpush3.xpose.msk.msra.mxu1 %vm1731_vm5, %v2312_v56 }
 0x1f6   : > { %6340 = vmatprep.subr.mxu1 %v6604_v38 }
 0x1f8   : > { %5102 = vrot.lane.b32.xlu0 %v7695_v16, %s6606_s7  ;;  %v2395_v22 = vpop.permute.xlu0 %2394  ;;  %6338 = vmatmul.mubr.msk.f32.vlgmr.msra.gmra.mrb[26].mxu1 %vm1731_vm5, %v8450_v59 }
 0x1f9   : > { %5025 = vrot.lane.b32.xlu1 %v7671_v13, %s6606_s7  ;;  %6341 = vmatpush3.xpose.msk.msra.mxu1 %vm1731_vm5, %v2395_v22  ;;  %v8453_v13 = vld [vmem:[#allocation18_spill] sm:$0xff] }
 0x1fa   : > { %6342 = vmatprep.mubr.msk.f32.mxu1 %vm6605_vm6, %v6604_v38  ;;  %6345 = vmatprep.subr.mxu1 %v6604_v38 }
 0x1fc   : > { %5256 = vrot.lane.b32.xlu0 %v7731_v7, %s6606_s7  ;;  %6343 = vmatmul.mubr.msk.f32.vlgmr.msra.gmra.mrb[28].mxu1 %vm1731_vm5, %v8451_v29  ;;  %v8460_v7 = vld [vmem:[#allocation38_spill] sm:$0xff] }
 0x1fd   : > { %5179 = vrot.lane.b32.xlu1 %v7708_v21, %s6606_s7  ;;  %6347 = vmatprep.mubr.msk.f32.mxu1 %vm6605_vm6, %v6604_v38  ;;  %v8454_v21 = vld [vmem:[#allocation17_spill] sm:$0xff] }
 0x200   : > { %5410 = vrot.lane.b32.xlu0 %v7754_v6, %s6606_s7 }
 0x201   : > { %5333 = vrot.lane.b32.xlu1 %v7741_v15, %s6606_s7  ;;  %v8464_v15 = vld [vmem:[#allocation46_spill] sm:$0xff] }
 0x205   : > { %5487 = vrot.lane.b32.xlu1 %v3638_v47, %s6606_s7 }
 0x208   : > { %v2478_v24 = vpop.permute.xlu1 %2477 }
 0x209   : > { %6346 = vmatpush3.xpose.msk.msra.mxu1 %vm1731_vm5, %v2478_v24 }
 0x20a   : > { %6350 = vmatprep.subr.mxu1 %v6604_v38 }
 0x20b   : > { %v2561_v0 = vpop.permute.xlu0 %2560 }
 0x20c   : > { %6348 = vmatmul.mubr.msk.f32.vlgmr.msra.gmra.mrb[30].mxu1 %vm1731_vm5, %v8452_v41 }
 0x20d   : > { %6351 = vmatpush3.xpose.msk.msra.mxu1 %vm1731_vm5, %v2561_v0  ;;  %6352 = vmatprep.mubr.msk.f32.mxu1 %vm6605_vm6, %v6604_v38 }
 0x20e   : > { %6355 = vmatprep.subr.mxu1 %v6604_v38 }
 0x210   : > { %6353 = vmatmul.mubr.msk.f32.vlgmr.msra.gmra.mrb[32].mxu1 %vm1731_vm5, %v8453_v13 }
 0x211   : > { %6357 = vmatprep.mubr.msk.f32.mxu1 %vm6605_vm6, %v6604_v38 }
 0x212   : > { %v2644_v16 = vpop.permute.xlu1 %2643 }
 0x213   : > { %6356 = vmatpush3.xpose.msk.msra.mxu1 %vm1731_vm5, %v2644_v16 }
 0x214   : > { %6365 = vmatprep.subr.mxu1 %v6604_v38 }
 0x216   : > { %6358 = vmatmul.mubr.msk.f32.vlgmr.msra.gmra.mrb[34].mxu1 %vm1731_vm5, %v8454_v21 }
 0x217   : > { %6367 = vmatprep.mubr.msk.f32.mxu1 %vm6605_vm6, %v6604_v38 }
 0x219   : > { %v2727_v37 = vpop.permute.xlu0 %2726 }
 0x21a   : > { %6361 = vmatpush3.xpose.msk.msra.mxu0 %vm1731_vm5, %v2727_v37 }
 0x21b   : > { %6370 = vmatprep.subr.mxu0 %v6604_v38 }
 0x21d   : > { %v2810_v34 = vpop.permute.xlu1 %2809  ;;  %6363 = vmatmul.mubr.msk.f32.vlgmr.msra.gmra.mrb[12].mxu0 %vm1731_vm5, %v8455_v8 }
 0x21e   : > { %6366 = vmatpush3.xpose.msk.msra.mxu1 %vm1731_vm5, %v2810_v34  ;;  %6372 = vmatprep.mubr.msk.f32.mxu0 %vm6605_vm6, %v6604_v38 }
 0x21f   : > { %6375 = vmatprep.subr.mxu1 %v6604_v38 }
 0x220   : > { %v2893_v10 = vpop.permute.xlu0 %2892 }
 0x221   : > { %6371 = vmatpush3.xpose.msk.msra.mxu0 %vm1731_vm5, %v2893_v10  ;;  %6368 = vmatmul.mubr.msk.f32.vlgmr.msra.gmra.mrb[36].mxu1 %vm1731_vm5, %v8456_v39 }
 0x222   : > { %6380 = vmatprep.subr.mxu0 %v6604_v38  ;;  %6377 = vmatprep.mubr.msk.f32.mxu1 %vm6605_vm6, %v6604_v38 }
 0x224   : > { %6373 = vmatmul.mubr.msk.f32.vlgmr.msra.gmra.mrb[14].mxu0 %vm1731_vm5, %v8457_v53 }
 0x225   : > { %6382 = vmatprep.mubr.msk.f32.mxu0 %vm6605_vm6, %v6604_v38 }
 0x226   : > { %v2976_v57 = vpop.permute.xlu1 %2975 }
 0x227   : > { %6376 = vmatpush3.xpose.msk.msra.mxu1 %vm1731_vm5, %v2976_v57 }
 0x228   : > { %6385 = vmatprep.subr.mxu1 %v6604_v38 }
 0x229   : > { %v3059_v36 = vpop.permute.xlu0 %3058 }
 0x22a   : > { %6381 = vmatpush3.xpose.msk.msra.mxu0 %vm1731_vm5, %v3059_v36  ;;  %6378 = vmatmul.mubr.msk.f32.vlgmr.msra.gmra.mrb[38].mxu1 %vm1731_vm5, %v8458_v9 }
 0x22b   : > { %6390 = vmatprep.subr.mxu0 %v6604_v38  ;;  %6387 = vmatprep.mubr.msk.f32.mxu1 %vm6605_vm6, %v6604_v38 }
 0x22d   : > { %v3142_v43 = vpop.permute.xlu1 %3141  ;;  %6383 = vmatmul.mubr.msk.f32.vlgmr.msra.gmra.mrb[16].mxu0 %vm1731_vm5, %v8459_v14 }
 0x22e   : > { %6386 = vmatpush3.xpose.msk.msra.mxu1 %vm1731_vm5, %v3142_v43  ;;  %6392 = vmatprep.mubr.msk.f32.mxu0 %vm6605_vm6, %v6604_v38 }
 0x22f   : > { %6395 = vmatprep.subr.mxu1 %v6604_v38 }
 0x231   : > { %6388 = vmatmul.mubr.msk.f32.vlgmr.msra.gmra.mrb[40].mxu1 %vm1731_vm5, %v8460_v7 }
 0x232   : > { %v3225_v11 = vpop.permute.xlu0 %3224  ;;  %6397 = vmatprep.mubr.msk.f32.mxu1 %vm6605_vm6, %v6604_v38 }
 0x233   : > { %6391 = vmatpush3.xpose.msk.msra.mxu0 %vm1731_vm5, %v3225_v11 }
 0x234   : > { %6400 = vmatprep.subr.mxu0 %v6604_v38 }
 0x236   : > { %v3308_v3 = vpop.permute.xlu1 %3307  ;;  %6393 = vmatmul.mubr.msk.f32.vlgmr.msra.gmra.mrb[18].mxu0 %vm1731_vm5, %v8461_v12 }
 0x237   : > { %6396 = vmatpush3.xpose.msk.msra.mxu1 %vm1731_vm5, %v3308_v3  ;;  %6402 = vmatprep.mubr.msk.f32.mxu0 %vm6605_vm6, %v6604_v38 }
 0x238   : > { %6405 = vmatprep.subr.mxu1 %v6604_v38 }
 0x23a   : > { %6398 = vmatmul.mubr.msk.f32.vlgmr.msra.gmra.mrb[42].mxu1 %vm1731_vm5, %v8462_v23 }
 0x23b   : > { %v3391_v1 = vpop.permute.xlu0 %3390  ;;  %6407 = vmatprep.mubr.msk.f32.mxu1 %vm6605_vm6, %v6604_v38 }
 0x23c   : > { %6401 = vmatpush3.xpose.msk.msra.mxu0 %vm1731_vm5, %v3391_v1 }
 0x23d   : > { %6410 = vmatprep.subr.mxu0 %v6604_v38 }
 0x23f   : > { %v3474_v55 = vpop.permute.xlu1 %3473  ;;  %6403 = vmatmul.mubr.msk.f32.vlgmr.msra.gmra.mrb[20].mxu0 %vm1731_vm5, %v8463_v58 }
 0x240   : > { %6406 = vmatpush3.xpose.msk.msra.mxu1 %vm1731_vm5, %v3474_v55  ;;  %6412 = vmatprep.mubr.msk.f32.mxu0 %vm6605_vm6, %v6604_v38 }
 0x241   : > { %6415 = vmatprep.subr.mxu1 %v6604_v38 }
 0x242   : > { %v3557_v44 = vpop.permute.xlu0 %3556 }
 0x243   : > { %6411 = vmatpush3.xpose.msk.msra.mxu0 %vm1731_vm5, %v3557_v44  ;;  %6408 = vmatmul.mubr.msk.f32.vlgmr.msra.gmra.mrb[44].mxu1 %vm1731_vm5, %v8464_v15 }
 0x244   : > { %6420 = vmatprep.subr.mxu0 %v6604_v38  ;;  %6417 = vmatprep.mubr.msk.f32.mxu1 %vm6605_vm6, %v6604_v38 }
 0x246   : > { %6413 = vmatmul.mubr.msk.f32.vlgmr.msra.gmra.mrb[22].mxu0 %vm1731_vm5, %v8465_v62  ;;  %v3716_v28 = vpop.permute.xlu0 %3715 }
 0x247   : > { %v3640_v2 = vpop.permute.xlu1 %3639  ;;  %6421 = vmatpush3.msk.msra.mxu0 %vm3720_vm7, %v3716_v28  ;;  %6422 = vmatprep.mubr.msk.f32.mxu0 %vm6605_vm6, %v6604_v38 }
 0x248   : > { %6416 = vmatpush3.xpose.msk.msra.mxu1 %vm1731_vm5, %v3640_v2  ;;  %6430 = vmatprep.subr.mxu0 %v6604_v38 }
 0x249   : > { %6425 = vmatprep.subr.mxu1 %v6604_v38 }
 0x24a   : > { %v3871_v6 = vpop.permute.xlu0 %3870 }
 0x24b   : > { %v3794_v25 = vpop.permute.xlu1 %3793  ;;  %6418 = vmatmul.mubr.msk.f32.vlgmr.msra.gmra.mrb[46].mxu1 %vm1731_vm5, %v8466_v26 }
 0x24c   : > { %6426 = vmatpush3.msk.msra.mxu1 %vm3720_vm7, %v3794_v25  ;;  %6427 = vmatprep.mubr.msk.f32.mxu1 %vm6605_vm6, %v6604_v38  ;;  %v5564_v25 = vld [vmem:[%s8207_s3] sm:$0xf] }
 0x24d   : > { %6435 = vmatprep.subr.mxu1 %v6604_v38 }
 0x24e   : > { %v4025_v51 = vpop.permute.xlu0 %4024 }
 0x24f   : > { %v3948_v30 = vpop.permute.xlu1 %3947 }
 0x252   : > { %v4179_v48 = vpop.permute.xlu0 %4178 }
 0x253   : > { %v4102_v49 = vpop.permute.xlu1 %4101 }
 0x256   : > { %v4333_v19 = vpop.permute.xlu0 %4332 }
 0x257   : > { %v4256_v61 = vpop.permute.xlu1 %4255 }
 0x25a   : > { %v4487_v40 = vpop.permute.xlu0 %4486 }
 0x25b   : > { %v4410_v35 = vpop.permute.xlu1 %4409 }
 0x25e   : > { %v4641_v24 = vpop.permute.xlu0 %4640 }
 0x25f   : > { %v4564_v22 = vpop.permute.xlu1 %4563 }
 0x262   : > { %v4795_v37 = vpop.permute.xlu0 %4794 }
 0x263   : > { %v4718_v13 = vpop.permute.xlu1 %4717 }
 0x266   : > { %v4949_v53 = vpop.permute.xlu0 %4948 }
 0x267   : > { %v4872_v10 = vpop.permute.xlu1 %4871 }
 0x26a   : > { %v5103_v11 = vpop.permute.xlu0 %5102 }
 0x26b   : > { %v5026_v43 = vpop.permute.xlu1 %5025 }
 0x26e   : > { %v5257_v58 = vpop.permute.xlu0 %5256 }
 0x26f   : > { %v5180_v23 = vpop.permute.xlu1 %5179 }
 0x272   : > { %v5411_v26 = vpop.permute.xlu0 %5410 }
 0x273   : > { %v5334_v2 = vpop.permute.xlu1 %5333 }
 0x2a1   : > { %v1802_v18 = vpop.f32.mrb[12].mxu1 }
 0x2a2   : > { %v6304_v45 = vpop.f32.mrb[13].mxu1  ;;  %6423 = vmatmul.mubr.msk.f32.vlgmr.msra.gmra.mrb[24].mxu0 %vm1731_vm5, %v1802_v18 }
 0x2a3   : > { %6431 = vmatpush3.msk.msra.mxu0 %vm3720_vm7, %v3871_v6  ;;  %6432 = vmatprep.mubr.msk.f32.mxu0 %vm6605_vm6, %v6604_v38  ;;  %v5488_v45 = vpop.permute.xlu1 %5487 }
 0x2a4   : > { %6440 = vmatprep.subr.mxu0 %v6604_v38 }
 0x2a5   : > { %v1885_v50 = vpop.f32.mrb[14].mxu1 }
 0x2a6   : > { %v6309_v32 = vpop.f32.mrb[15].mxu1  ;;  %6428 = vmatmul.mubr.msk.f32.vlgmr.msra.gmra.mrb[48].mxu1 %vm1731_vm5, %v1885_v50 }
 0x2a7   : > { %6436 = vmatpush3.msk.msra.mxu1 %vm3720_vm7, %v3948_v30  ;;  %6437 = vmatprep.mubr.msk.f32.mxu1 %vm6605_vm6, %v6604_v38 }
 0x2a8   : > { %6445 = vmatprep.subr.mxu1 %v6604_v38 }
 0x2a9   : > { %v1968_v47 = vpop.f32.mrb[16].mxu1 }
 0x2aa   : > { %v6314_v54 = vpop.f32.mrb[17].mxu1  ;;  %6433 = vmatmul.mubr.msk.f32.vlgmr.msra.gmra.mrb[26].mxu0 %vm1731_vm5, %v1968_v47 }
 0x2ab   : > { %6441 = vmatpush3.msk.msra.mxu0 %vm3720_vm7, %v4025_v51  ;;  %6442 = vmatprep.mubr.msk.f32.mxu0 %vm6605_vm6, %v6604_v38 }
 0x2ac   : > { %6450 = vmatprep.subr.mxu0 %v6604_v38 }
 0x2ad   : > { %v2051_v52 = vpop.f32.mrb[18].mxu1 }
 0x2ae   : > { %v6319_v4 = vpop.f32.mrb[19].mxu1  ;;  %6438 = vmatmul.mubr.msk.f32.vlgmr.msra.gmra.mrb[50].mxu1 %vm1731_vm5, %v2051_v52 }
 0x2af   : > { %6446 = vmatpush3.msk.msra.mxu1 %vm3720_vm7, %v4102_v49  ;;  %6447 = vmatprep.mubr.msk.f32.mxu1 %vm6605_vm6, %v6604_v38 }
 0x2b0   : > { %6455 = vmatprep.subr.mxu1 %v6604_v38 }
 0x2b1   : > { %v2134_v63 = vpop.f32.mrb[20].mxu1 }
 0x2b2   : > { %v6324_v20 = vpop.f32.mrb[21].mxu1  ;;  %6443 = vmatmul.mubr.msk.f32.vlgmr.msra.gmra.mrb[28].mxu0 %vm1731_vm5, %v2134_v63 }
 0x2b3   : > { %6451 = vmatpush3.msk.msra.mxu0 %vm3720_vm7, %v4179_v48  ;;  %6452 = vmatprep.mubr.msk.f32.mxu0 %vm6605_vm6, %v6604_v38 }
 0x2b4   : > { %6460 = vmatprep.subr.mxu0 %v6604_v38 }
 0x2b8   : > { %v2217_v27 = vpop.f32.mrb[22].mxu1 }
 0x2b9   : > { %v6329_v60 = vpop.f32.mrb[23].mxu1  ;;  %6448 = vmatmul.mubr.msk.f32.vlgmr.msra.gmra.mrb[52].mxu1 %vm1731_vm5, %v2217_v27 }
 0x2ba   : > { %6456 = vmatpush3.msk.msra.mxu1 %vm3720_vm7, %v4256_v61  ;;  %6457 = vmatprep.mubr.msk.f32.mxu1 %vm6605_vm6, %v6604_v38 }
 0x2bb   : > { %6465 = vmatprep.subr.mxu1 %v6604_v38 }
 0x2bd   : > { %v2300_v42 = vpop.f32.mrb[24].mxu1 }
 0x2be   : > { %v6334_v46 = vpop.f32.mrb[25].mxu1  ;;  %6453 = vmatmul.mubr.msk.f32.vlgmr.msra.gmra.mrb[30].mxu0 %vm1731_vm5, %v2300_v42 }
 0x2bf   : > { %6461 = vmatpush3.msk.msra.mxu0 %vm3720_vm7, %v4333_v19  ;;  %6462 = vmatprep.mubr.msk.f32.mxu0 %vm6605_vm6, %v6604_v38 }
 0x2c0   : > { %6470 = vmatprep.subr.mxu0 %v6604_v38 }
 0x2cb   : > { %v2383_v17 = vpop.f32.mrb[26].mxu1 }
 0x2cc   : > { %v6339_v33 = vpop.f32.mrb[27].mxu1  ;;  %6458 = vmatmul.mubr.msk.f32.vlgmr.msra.gmra.mrb[54].mxu1 %vm1731_vm5, %v2383_v17 }
 0x2cd   : > { %6466 = vmatpush3.msk.msra.mxu1 %vm3720_vm7, %v4410_v35  ;;  %6467 = vmatprep.mubr.msk.f32.mxu1 %vm6605_vm6, %v6604_v38 }
 0x2ce   : > { %6475 = vmatprep.subr.mxu1 %v6604_v38 }
 0x2cf   : > { %v2466_v5 = vpop.f32.mrb[28].mxu1 }
 0x2d0   : > { %v6344_v31 = vpop.f32.mrb[29].mxu1  ;;  %6463 = vmatmul.mubr.msk.f32.vlgmr.msra.gmra.mrb[32].mxu0 %vm1731_vm5, %v2466_v5 }
 0x2d1   : > { %6471 = vmatpush3.msk.msra.mxu0 %vm3720_vm7, %v4487_v40  ;;  %6472 = vmatprep.mubr.msk.f32.mxu0 %vm6605_vm6, %v6604_v38 }
 0x2d2   : > { %6480 = vmatprep.subr.mxu0 %v6604_v38 }
 0x2df   : > { %v2549_v56 = vpop.f32.mrb[30].mxu1 }
 0x2e0   : > { %v6349_v59 = vpop.f32.mrb[31].mxu1  ;;  %6468 = vmatmul.mubr.msk.f32.vlgmr.msra.gmra.mrb[56].mxu1 %vm1731_vm5, %v2549_v56 }
 0x2e1   : > { %6476 = vmatpush3.msk.msra.mxu1 %vm3720_vm7, %v4564_v22  ;;  %6477 = vmatprep.mubr.msk.f32.mxu1 %vm6605_vm6, %v6604_v38 }
 0x2e2   : > { %6485 = vmatprep.subr.mxu1 %v6604_v38 }
 0x2e3   : > { %v2632_v29 = vpop.f32.mrb[32].mxu1 }
 0x2e4   : > { %v6354_v0 = vpop.f32.mrb[33].mxu1  ;;  %6473 = vmatmul.mubr.msk.f32.vlgmr.msra.gmra.mrb[34].mxu0 %vm1731_vm5, %v2632_v29 }
 0x2e5   : > { %6481 = vmatpush3.msk.msra.mxu0 %vm3720_vm7, %v4641_v24  ;;  %6482 = vmatprep.mubr.msk.f32.mxu0 %vm6605_vm6, %v6604_v38 }
 0x2e6   : > { %6490 = vmatprep.subr.mxu0 %v6604_v38 }
 0x2e9   : > { %v2715_v41 = vpop.f32.mrb[34].mxu1 }
 0x2ea   : > { %v6359_v16 = vpop.f32.mrb[35].mxu1  ;;  %6478 = vmatmul.mubr.msk.f32.vlgmr.msra.gmra.mrb[58].mxu1 %vm1731_vm5, %v2715_v41 }
 0x2eb   : > { %6486 = vmatpush3.msk.msra.mxu1 %vm3720_vm7, %v4718_v13  ;;  %6487 = vmatprep.mubr.msk.f32.mxu1 %vm6605_vm6, %v6604_v38 }
 0x2ec   : > { %6495 = vmatprep.subr.mxu1 %v6604_v38 }
 0x2f0   : > { %v2798_v21 = vpop.f32.mrb[12].mxu0 }
 0x2f1   : > { %v6364_v34 = vpop.f32.mrb[13].mxu0  ;;  %6483 = vmatmul.mubr.msk.f32.vlgmr.msra.gmra.mrb[36].mxu0 %vm1731_vm5, %v2798_v21 }
 0x2f2   : > { %6491 = vmatpush3.msk.msra.mxu0 %vm3720_vm7, %v4795_v37  ;;  %6492 = vmatprep.mubr.msk.f32.mxu0 %vm6605_vm6, %v6604_v38 }
 0x2f3   : > { %6500 = vmatprep.subr.mxu0 %v6604_v38 }
 0x2f4   : > { %v2881_v8 = vpop.f32.mrb[36].mxu1 }
 0x2f5   : > { %v6369_v39 = vpop.f32.mrb[37].mxu1  ;;  %6488 = vmatmul.mubr.msk.f32.vlgmr.msra.gmra.mrb[60].mxu1 %vm1731_vm5, %v2881_v8 }
 0x2f6   : > { %6496 = vmatpush3.msk.msra.mxu1 %vm3720_vm7, %v4872_v10  ;;  %6497 = vmatprep.mubr.msk.f32.mxu1 %vm6605_vm6, %v6604_v38 }
 0x2f7   : > { %v2964_v57 = vpop.f32.mrb[14].mxu0  ;;  %6505 = vmatprep.subr.mxu1 %v6604_v38 }
 0x2f8   : > { %v6374_v36 = vpop.f32.mrb[15].mxu0  ;;  %6493 = vmatmul.mubr.msk.f32.vlgmr.msra.gmra.mrb[38].mxu0 %vm1731_vm5, %v2964_v57 }
 0x2f9   : > { %6501 = vmatpush3.msk.msra.mxu0 %vm3720_vm7, %v4949_v53  ;;  %6502 = vmatprep.mubr.msk.f32.mxu0 %vm6605_vm6, %v6604_v38 }
 0x2fa   : > { %6510 = vmatprep.subr.mxu0 %v6604_v38 }
 0x2fd   : > { %v3047_v9 = vpop.f32.mrb[38].mxu1 }
 0x2fe   : > { %v6379_v14 = vpop.f32.mrb[39].mxu1  ;;  %6498 = vmatmul.mubr.msk.f32.vlgmr.msra.gmra.mrb[62].mxu1 %vm1731_vm5, %v3047_v9 }
 0x2ff   : > { %6506 = vmatpush3.msk.msra.mxu1 %vm3720_vm7, %v5026_v43  ;;  %6507 = vmatprep.mubr.msk.f32.mxu1 %vm6605_vm6, %v6604_v38 }
 0x300   : > { %v3130_v7 = vpop.f32.mrb[16].mxu0  ;;  %6515 = vmatprep.subr.mxu1 %v6604_v38 }
 0x301   : > { %v6384_v3 = vpop.f32.mrb[17].mxu0  ;;  %6503 = vmatmul.mubr.msk.f32.vlgmr.msra.gmra.mrb[40].mxu0 %vm1731_vm5, %v3130_v7 }
 0x302   : > { %6511 = vmatpush3.msk.msra.mxu0 %vm3720_vm7, %v5103_v11  ;;  %6512 = vmatprep.mubr.msk.f32.mxu0 %vm6605_vm6, %v6604_v38 }
 0x303   : > { %6520 = vmatprep.subr.mxu0 %v6604_v38 }
 0x304   : > { %v3213_v12 = vpop.f32.mrb[40].mxu1 }
 0x305   : > { %v6389_v1 = vpop.f32.mrb[41].mxu1  ;;  %6508 = vmatmul.mubr.msk.f32.vlgmr.msra.gmra.mrb[64].mxu1 %vm1731_vm5, %v3213_v12 }
 0x306   : > { %6516 = vmatpush3.msk.msra.mxu1 %vm3720_vm7, %v5180_v23  ;;  %6517 = vmatprep.mubr.msk.f32.mxu1 %vm6605_vm6, %v6604_v38 }
 0x307   : > { %6525 = vmatprep.subr.mxu1 %v6604_v38 }
 0x309   : > { %v3296_v55 = vpop.f32.mrb[18].mxu0 }
 0x30a   : > { %v6394_v44 = vpop.f32.mrb[19].mxu0  ;;  %6513 = vmatmul.mubr.msk.f32.vlgmr.msra.gmra.mrb[42].mxu0 %vm1731_vm5, %v3296_v55 }
 0x30b   : > { %6521 = vmatpush3.msk.msra.mxu0 %vm3720_vm7, %v5257_v58  ;;  %6522 = vmatprep.mubr.msk.f32.mxu0 %vm6605_vm6, %v6604_v38  ;;  %v8096_v58 = vld [vmem:[%s8208_s4] ss:$0 sm:$0xff] }
 0x30c   : > { %6530 = vmatprep.subr.mxu0 %v6604_v38 }
 0x30d   : > { %v3379_v15 = vpop.f32.mrb[42].mxu1 }
 0x30e   : > { %v6399_v62 = vpop.f32.mrb[43].mxu1  ;;  %6518 = vmatmul.mubr.msk.f32.vlgmr.msra.gmra.mrb[66].mxu1 %vm1731_vm5, %v3379_v15  ;;  %v5833_v15 = vld [vmem:[%s6656_s26 + $0x8] sm:$0xff] }
 0x30f   : > { %6526 = vmatpush3.msk.msra.mxu1 %vm3720_vm7, %v5334_v2  ;;  %6527 = vmatprep.mubr.msk.f32.mxu1 %vm6605_vm6, %v6604_v38 }
 0x310   : > { %6535 = vmatprep.subr.mxu1 %v6604_v38 }
 0x312   : > { %v3462_v28 = vpop.f32.mrb[20].mxu0 }
 0x313   : > { %v6404_v18 = vpop.f32.mrb[21].mxu0  ;;  %6523 = vmatmul.mubr.msk.f32.vlgmr.msra.gmra.mrb[44].mxu0 %vm1731_vm5, %v3462_v28  ;;  %v5832_v28 = vld [vmem:[%s6656_s26] sm:$0xff] }
 0x314   : > { %6531 = vmatpush3.msk.msra.mxu0 %vm3720_vm7, %v5411_v26  ;;  %6532 = vmatprep.mubr.msk.f32.mxu0 %vm6605_vm6, %v6604_v38 }
 0x315   : > { %6540 = vmatprep.subr.msk.mxu0 %vm3720_vm7, %v5564_v25 }
 0x316   : > { %v3545_v6 = vpop.f32.mrb[44].mxu1 }
 0x317   : > { %v6409_v50 = vpop.f32.mrb[45].mxu1  ;;  %6528 = vmatmul.mubr.msk.f32.vlgmr.msra.gmra.mrb[68].mxu1 %vm1731_vm5, %v3545_v6 }
 0x318   : > { %6536 = vmatpush3.msk.msra.mxu1 %vm3720_vm7, %v5488_v45  ;;  %6537 = vmatprep.mubr.msk.f32.mxu1 %vm6605_vm6, %v6604_v38  ;;  %v5835_v45 = vld [vmem:[%s6656_s26 + $0x18] sm:$0xff] }
 0x319   : > { %v3628_v30 = vpop.f32.mrb[22].mxu0 }
 0x31a   : > { %v6414_v32 = vpop.f32.mrb[23].mxu0  ;;  %6533 = vmatmul.mubr.msk.f32.vlgmr.msra.gmra.mrb[46].mxu0 %vm1731_vm5, %v3628_v30 }
 0x31b   : > { %6541 = vmatpush3.msk.msra.mxu0 %vm3720_vm7, %v5564_v25  ;;  %v5834_v32 = vld [vmem:[%s6656_s26 + $0x10] sm:$0xff] }
 0x31e   : > { %v3711_v47 = vpop.f32.mrb[46].mxu1 }
 0x31f   : > { %v6419_v51 = vpop.f32.mrb[47].mxu1  ;;  %6538 = vmatmul.mubr.msk.f32.vlgmr.msra.gmra.mrb[70].mxu1 %vm1731_vm5, %v3711_v47 }
 0x375   : > { %v3789_v54 = vpop.f32.mrb[24].mxu0 }
 0x376   : > { %v6424_v52 = vpop.f32.mrb[25].mxu0  ;;  %6542 = vmatprep.mubr.msk.f32.mxu0 %vm1731_vm5, %v3789_v54 }
 0x379   : > { %v3866_v49 = vpop.f32.mrb[48].mxu1 }
 0x37a   : > { %v6429_v4 = vpop.f32.mrb[49].mxu1  ;;  %6543 = vmatmul.mubr.msk.f32.vlgmr.msra.gmra.mrb[48].mxu0 %vm1731_vm5, %v3866_v49  ;;  %v5837_v49 = vld [vmem:[%s6656_s26 + $0x28] sm:$0xff] }
 0x37d   : > { %v3943_v63 = vpop.f32.mrb[26].mxu0 }
 0x37e   : > { %v6434_v38 = vpop.f32.mrb[27].mxu0  ;;  %6545 = vmatprep.mubr.msk.f32.mxu0 %vm1731_vm5, %v3943_v63 }
 0x37f   : > { %v5836_v38 = vld [vmem:[%s6656_s26 + $0x20] sm:$0xff] }
 0x381   : > { %v4020_v48 = vpop.f32.mrb[50].mxu1 }
 0x382   : > { %v6439_v20 = vpop.f32.mrb[51].mxu1  ;;  %6546 = vmatmul.mubr.msk.f32.gmra.mrb[50].mxu0 %vm1731_vm5, %v4020_v48 }
 0x385   : > { %v4097_v27 = vpop.f32.mrb[28].mxu0 }
 0x386   : > { %v6444_v61 = vpop.f32.mrb[29].mxu0  ;;  %6548 = vmatprep.mubr.msk.f32.mxu0 %vm1731_vm5, %v4097_v27 }
 0x38c   : > { %v4174_v60 = vpop.f32.mrb[52].mxu1 }
 0x38d   : > { %v6449_v42 = vpop.f32.mrb[53].mxu1  ;;  %6549 = vmatmul.mubr.msk.f32.gmra.mrb[52].mxu0 %vm1731_vm5, %v4174_v60  ;;  %v5839_v60 = vld [vmem:[%s6656_s26 + $0x38] sm:$0xff] }
 0x391   : > { %v4251_v19 = vpop.f32.mrb[30].mxu0 }
 0x392   : > { %v6454_v46 = vpop.f32.mrb[31].mxu0  ;;  %6551 = vmatprep.mubr.msk.f32.mxu0 %vm1731_vm5, %v4251_v19 }
 0x393   : > { %v5838_v46 = vld [vmem:[%s6656_s26 + $0x30] sm:$0xff] }
 0x39f   : > { %v4328_v17 = vpop.f32.mrb[54].mxu1 }
 0x3a0   : > { %v6459_v35 = vpop.f32.mrb[55].mxu1  ;;  %6552 = vmatmul.mubr.msk.f32.gmra.mrb[54].mxu0 %vm1731_vm5, %v4328_v17 }
 0x3a3   : > { %v4405_v33 = vpop.f32.mrb[32].mxu0 }
 0x3a4   : > { %v6464_v5 = vpop.f32.mrb[33].mxu0  ;;  %6554 = vmatprep.mubr.msk.f32.mxu0 %vm1731_vm5, %v4405_v33 }
 0x3b3   : > { %v4482_v40 = vpop.f32.mrb[56].mxu1 }
 0x3b4   : > { %v6469_v31 = vpop.f32.mrb[57].mxu1  ;;  %6555 = vmatmul.mubr.msk.f32.gmra.mrb[56].mxu0 %vm1731_vm5, %v4482_v40  ;;  %v5841_v40 = vld [vmem:[%s6656_s26 + $0x48] sm:$0xff] }
 0x3b7   : > { %v4559_v56 = vpop.f32.mrb[34].mxu0 }
 0x3b8   : > { %v6474_v22 = vpop.f32.mrb[35].mxu0  ;;  %6557 = vmatprep.mubr.msk.f32.mxu0 %vm1731_vm5, %v4559_v56 }
 0x3b9   : > { %v5840_v22 = vld [vmem:[%s6656_s26 + $0x40] sm:$0xff] }
 0x3bd   : > { %v4636_v59 = vpop.f32.mrb[58].mxu1 }
 0x3be   : > { %v6479_v29 = vpop.f32.mrb[59].mxu1  ;;  %6558 = vmatmul.mubr.msk.f32.gmra.mrb[58].mxu0 %vm1731_vm5, %v4636_v59 }
 0x3c4   : > { %v4713_v24 = vpop.f32.mrb[36].mxu0 }
 0x3c5   : > { %v6484_v0 = vpop.f32.mrb[37].mxu0  ;;  %6560 = vmatprep.mubr.msk.f32.mxu0 %vm1731_vm5, %v4713_v24 }
 0x3c8   : > { %v4790_v41 = vpop.f32.mrb[60].mxu1 }
 0x3c9   : > { %v6489_v13 = vpop.f32.mrb[61].mxu1  ;;  %6561 = vmatmul.mubr.msk.f32.gmra.mrb[60].mxu0 %vm1731_vm5, %v4790_v41  ;;  %v5843_v41 = vld [vmem:[%s6656_s26 + $0x58] sm:$0xff] }
 0x3cb   : > { %v4867_v16 = vpop.f32.mrb[38].mxu0 }
 0x3cc   : > { %v6494_v21 = vpop.f32.mrb[39].mxu0  ;;  %6563 = vmatprep.mubr.msk.f32.mxu0 %vm1731_vm5, %v4867_v16 }
 0x3cd   : > { %v5842_v21 = vld [vmem:[%s6656_s26 + $0x50] sm:$0xff] }
 0x3d1   : > { %v4944_v37 = vpop.f32.mrb[62].mxu1 }
 0x3d2   : > { %v6499_v34 = vpop.f32.mrb[63].mxu1  ;;  %6564 = vmatmul.mubr.msk.f32.gmra.mrb[62].mxu0 %vm1731_vm5, %v4944_v37 }
 0x3d4   : > { %v5021_v8 = vpop.f32.mrb[40].mxu0 }
 0x3d5   : > { %v6504_v10 = vpop.f32.mrb[41].mxu0  ;;  %6566 = vmatprep.mubr.msk.f32.mxu0 %vm1731_vm5, %v5021_v8 }
 0x3d8   : > { %v5098_v39 = vpop.f32.mrb[64].mxu1 }
 0x3d9   : > { %v6509_v57 = vpop.f32.mrb[65].mxu1  ;;  %6567 = vmatmul.mubr.msk.f32.gmra.mrb[64].mxu0 %vm1731_vm5, %v5098_v39  ;;  %v5845_v39 = vld [vmem:[%s6656_s26 + $0x68] sm:$0xff] }
 0x3dd   : > { %v5175_v53 = vpop.f32.mrb[42].mxu0 }
 0x3de   : > { %v6514_v36 = vpop.f32.mrb[43].mxu0  ;;  %6569 = vmatprep.mubr.msk.f32.mxu0 %vm1731_vm5, %v5175_v53 }
 0x3df   : > { %v5844_v36 = vld [vmem:[%s6656_s26 + $0x60] sm:$0xff] }
 0x3e1   : > { %v5252_v9 = vpop.f32.mrb[66].mxu1 }
 0x3e2   : > { %v6519_v43 = vpop.f32.mrb[67].mxu1  ;;  %6570 = vmatmul.mubr.msk.f32.gmra.mrb[66].mxu0 %vm1731_vm5, %v5252_v9 }
 0x3e6   : > { %v5329_v14 = vpop.f32.mrb[44].mxu0 }
 0x3e7   : > { %v6524_v7 = vpop.f32.mrb[45].mxu0  ;;  %6572 = vmatprep.mubr.msk.f32.mxu0 %vm1731_vm5, %v5329_v14 }
 0x3ea   : > { %v5406_v11 = vpop.f32.mrb[68].mxu1 }
 0x3eb   : > { %v6529_v3 = vpop.f32.mrb[69].mxu1  ;;  %6573 = vmatmul.mubr.msk.f32.gmra.mrb[68].mxu0 %vm1731_vm5, %v5406_v11  ;;  %v5847_v11 = vld [vmem:[%s6656_s26 + $0x78] sm:$0xff] }
 0x3ed   : > { %v5483_v12 = vpop.f32.mrb[46].mxu0 }
 0x3ee   : > { %v6534_v23 = vpop.f32.mrb[47].mxu0  ;;  %6575 = vmatprep.mubr.msk.f32.mxu0 %vm1731_vm5, %v5483_v12 }
 0x3ef   : > { %v5846_v23 = vld [vmem:[%s6656_s26 + $0x70] sm:$0xff] }
 0x3f2   : > { %v5560_v1 = vpop.f32.mrb[70].mxu1 }
 0x3f3   : > { %v6539_v55 = vpop.f32.mrb[71].mxu1  ;;  %6576 = vmatmul.mubr.msk.f32.gmra.mrb[70].mxu0 %vm1731_vm5, %v5560_v1 }
 0x44d   : > { %v6544_v44 = vpop.f32.mrb[48].mxu0 }
 0x44e   : > { %v5719_v2 = vadd.f32 %v6544_v44, %v8096_v58  ;;  %v5713_v62 = vpop.f32.mrb[49].mxu0 }
 0x44f   : > { %v5714_v25 = vadd.f32 %v8096_v58, %v5713_v62 }
 0x450   : > { %v5857_v26 = vadd.f32 %v5833_v15, %v5719_v2  ;;  %v5849_v2 = vld [vmem:[%s6656_s26 + $0x88] sm:$0xff] }
 0x451   : > { %v5856_v18 = vadd.f32 %v5832_v28, %v5714_v25  ;;  %v5848_v25 = vld [vmem:[%s6656_s26 + $0x80] sm:$0xff] }
 0x452   : > { %5881 = vst.msk [vmem:[%s8106_s14 + $0x8] sm:$0xff] %vm260_vm0, %v5857_v26 }
 0x453   : > { %5880 = vst.msk [vmem:[%s8106_s14] sm:$0xff] %vm260_vm0, %v5856_v18 }
 0x455   : > { %v6547_v6 = vpop.f32.mrb[50].mxu0 }
 0x456   : > { %v5729_v50 = vadd.f32 %v6547_v6, %v8096_v58  ;;  %v5723_v30 = vpop.f32.mrb[51].mxu0 }
 0x457   : > { %v5724_v47 = vadd.f32 %v8096_v58, %v5723_v30 }
 0x458   : > { %v5859_v51 = vadd.f32 %v5835_v45, %v5729_v50  ;;  %v5851_v50 = vld [vmem:[%s6656_s26 + $0x98] sm:$0xff] }
 0x459   : > { %v5858_v54 = vadd.f32 %v5834_v32, %v5724_v47  ;;  %v5850_v47 = vld [vmem:[%s6656_s26 + $0x90] sm:$0xff] }
 0x45a   : > { %5883 = vst.msk [vmem:[%s8106_s14 + $0x18] sm:$0xff] %vm260_vm0, %v5859_v51 }
 0x45b   : > { %5882 = vst.msk [vmem:[%s8106_s14 + $0x10] sm:$0xff] %vm260_vm0, %v5858_v54 }
 0x460   : > { %v6550_v52 = vpop.f32.mrb[52].mxu0 }
 0x461   : > { %v5739_v4 = vadd.f32 %v6550_v52, %v8096_v58  ;;  %v5733_v63 = vpop.f32.mrb[53].mxu0 }
 0x462   : > { %v5734_v48 = vadd.f32 %v8096_v58, %v5733_v63 }
 0x463   : > { %v5861_v20 = vadd.f32 %v5837_v49, %v5739_v4  ;;  %v5853_v4 = vld [vmem:[%s6656_s26 + $0xa8] sm:$0xff] }
 0x464   : > { %v5860_v27 = vadd.f32 %v5836_v38, %v5734_v48  ;;  %v5852_v48 = vld [vmem:[%s6656_s26 + $0xa0] sm:$0xff] }
 0x465   : > { %5885 = vst.msk [vmem:[%s8106_s14 + $0x28] sm:$0xff] %vm260_vm0, %v5861_v20 }
 0x466   : > { %5884 = vst.msk [vmem:[%s8106_s14 + $0x20] sm:$0xff] %vm260_vm0, %v5860_v27 }
 0x473   : > { %v6553_v61 = vpop.f32.mrb[54].mxu0 }
 0x474   : > { %v5749_v42 = vadd.f32 %v6553_v61, %v8096_v58  ;;  %v5743_v19 = vpop.f32.mrb[55].mxu0 }
 0x475   : > { %v5744_v17 = vadd.f32 %v8096_v58, %v5743_v19 }
 0x476   : > { %v5863_v35 = vadd.f32 %v5839_v60, %v5749_v42  ;;  %v5855_v42 = vld [vmem:[%s6656_s26 + $0xb8] sm:$0xff] }
 0x477   : > { %v5862_v33 = vadd.f32 %v5838_v46, %v5744_v17  ;;  %v5854_v17 = vld [vmem:[%s6656_s26 + $0xb0] sm:$0xff] }
 0x478   : > { %5887 = vst.msk [vmem:[%s8106_s14 + $0x38] sm:$0xff] %vm260_vm0, %v5863_v35 }
 0x479   : > { %5886 = vst.msk [vmem:[%s8106_s14 + $0x30] sm:$0xff] %vm260_vm0, %v5862_v33 }
 0x487   : > { %v6556_v5 = vpop.f32.mrb[56].mxu0 }
 0x488   : > { %v5759_v31 = vadd.f32 %v6556_v5, %v8096_v58  ;;  %v5753_v56 = vpop.f32.mrb[57].mxu0 }
 0x489   : > { %v5754_v59 = vadd.f32 %v8096_v58, %v5753_v56 }
 0x48a   : > { %v5865_v29 = vadd.f32 %v5841_v40, %v5759_v31 }
 0x48b   : > { %v5864_v24 = vadd.f32 %v5840_v22, %v5754_v59 }
 0x48c   : > { %5889 = vst.msk [vmem:[%s8106_s14 + $0x48] sm:$0xff] %vm260_vm0, %v5865_v29 }
 0x48d   : > { %5888 = vst.msk [vmem:[%s8106_s14 + $0x40] sm:$0xff] %vm260_vm0, %v5864_v24 }
 0x491   : > { %v6559_v0 = vpop.f32.mrb[58].mxu0 }
 0x492   : > { %v5769_v13 = vadd.f32 %v6559_v0, %v8096_v58  ;;  %v5763_v16 = vpop.f32.mrb[59].mxu0 }
 0x493   : > { %v5764_v37 = vadd.f32 %v8096_v58, %v5763_v16 }
 0x494   : > { %v5867_v34 = vadd.f32 %v5843_v41, %v5769_v13 }
 0x495   : > { %v5866_v8 = vadd.f32 %v5842_v21, %v5764_v37 }
 0x496   : > { %5891 = vst.msk [vmem:[%s8106_s14 + $0x58] sm:$0xff] %vm260_vm0, %v5867_v34 }
 0x497   : > { %5890 = vst.msk [vmem:[%s8106_s14 + $0x50] sm:$0xff] %vm260_vm0, %v5866_v8 }
 0x49c   : > { %v6562_v10 = vpop.f32.mrb[60].mxu0 }
 0x49d   : > { %v5779_v57 = vadd.f32 %v6562_v10, %v8096_v58  ;;  %v5773_v53 = vpop.f32.mrb[61].mxu0 }
 0x49e   : > { %v5774_v9 = vadd.f32 %v8096_v58, %v5773_v53 }
 0x49f   : > { %v5869_v43 = vadd.f32 %v5845_v39, %v5779_v57 }
 0x4a0   : > { %v5868_v14 = vadd.f32 %v5844_v36, %v5774_v9 }
 0x4a1   : > { %5893 = vst.msk [vmem:[%s8106_s14 + $0x68] sm:$0xff] %vm260_vm0, %v5869_v43 }
 0x4a2   : > { %5892 = vst.msk [vmem:[%s8106_s14 + $0x60] sm:$0xff] %vm260_vm0, %v5868_v14 }
 0x4a5   : > { %v6565_v7 = vpop.f32.mrb[62].mxu0 }
 0x4a6   : > { %v5789_v3 = vadd.f32 %v6565_v7, %v8096_v58  ;;  %v5783_v12 = vpop.f32.mrb[63].mxu0 }
 0x4a7   : > { %v5784_v1 = vadd.f32 %v8096_v58, %v5783_v12 }
 0x4a8   : > { %v5871_v55 = vadd.f32 %v5847_v11, %v5789_v3 }
 0x4a9   : > { %v5870_v44 = vadd.f32 %v5846_v23, %v5784_v1 }
 0x4aa   : > { %5895 = vst.msk [vmem:[%s8106_s14 + $0x78] sm:$0xff] %vm260_vm0, %v5871_v55 }
 0x4ab   : > { %5894 = vst.msk [vmem:[%s8106_s14 + $0x70] sm:$0xff] %vm260_vm0, %v5870_v44 }
 0x4ac   : > { %v6568_v15 = vpop.f32.mrb[64].mxu0 }
 0x4ad   : > { %v5799_v62 = vadd.f32 %v6568_v15, %v8096_v58  ;;  %v5793_v28 = vpop.f32.mrb[65].mxu0 }
 0x4ae   : > { %v5794_v26 = vadd.f32 %v8096_v58, %v5793_v28 }
 0x4af   : > { %v5873_v18 = vadd.f32 %v5849_v2, %v5799_v62 }
 0x4b0   : > { %v5872_v6 = vadd.f32 %v5848_v25, %v5794_v26 }
 0x4b1   : > { %5897 = vst.msk [vmem:[%s8106_s14 + $0x88] sm:$0xff] %vm260_vm0, %v5873_v18 }
 0x4b2   : > { %5896 = vst.msk [vmem:[%s8106_s14 + $0x80] sm:$0xff] %vm260_vm0, %v5872_v6 }
 0x4b5   : > { %v6571_v45 = vpop.f32.mrb[66].mxu0 }
 0x4b6   : > { %v5809_v30 = vadd.f32 %v6571_v45, %v8096_v58  ;;  %v5803_v32 = vpop.f32.mrb[67].mxu0 }
 0x4b7   : > { %v5804_v51 = vadd.f32 %v8096_v58, %v5803_v32 }
 0x4b8   : > { %v5875_v54 = vadd.f32 %v5851_v50, %v5809_v30 }
 0x4b9   : > { %v5874_v52 = vadd.f32 %v5850_v47, %v5804_v51 }
 0x4ba   : > { %5899 = vst.msk [vmem:[%s8106_s14 + $0x98] sm:$0xff] %vm260_vm0, %v5875_v54 }
 0x4bb   : > { %5898 = vst.msk [vmem:[%s8106_s14 + $0x90] sm:$0xff] %vm260_vm0, %v5874_v52 }
 0x4be   : > { %v6574_v49 = vpop.f32.mrb[68].mxu0 }
 0x4bf   : > { %v5819_v63 = vadd.f32 %v6574_v49, %v8096_v58  ;;  %v5813_v38 = vpop.f32.mrb[69].mxu0 }
 0x4c0   : > { %v5814_v20 = vadd.f32 %v8096_v58, %v5813_v38 }
 0x4c1   : > { %v5877_v27 = vadd.f32 %v5853_v4, %v5819_v63 }
 0x4c2   : > { %v5876_v61 = vadd.f32 %v5852_v48, %v5814_v20 }
 0x4c3   : > { %5901 = vst.msk [vmem:[%s8106_s14 + $0xa8] sm:$0xff] %vm260_vm0, %v5877_v27 }
 0x4c4   : > { %5900 = vst.msk [vmem:[%s8106_s14 + $0xa0] sm:$0xff] %vm260_vm0, %v5876_v61 }
 0x4c6   : > { %v6577_v60 = vpop.f32.mrb[70].mxu0 }
 0x4c7   : > { %v5829_v19 = vadd.f32 %v6577_v60, %v8096_v58  ;;  %v5823_v46 = vpop.f32.mrb[71].mxu0 }
 0x4c8   : > { %v5824_v35 = vadd.f32 %v8096_v58, %v5823_v46 }
 0x4c9   : > { %v5879_v33 = vadd.f32 %v5855_v42, %v5829_v19 }
 0x4ca   : > { %v5878_v5 = vadd.f32 %v5854_v17, %v5824_v35 }
 0x4cb   : > { %5903 = vst.msk [vmem:[%s8106_s14 + $0xb8] sm:$0xff] %vm260_vm0, %v5879_v33 }
 0x4cc   : > { %5902 = vst.msk [vmem:[%s8106_s14 + $0xb0] sm:$0xff] %vm260_vm0, %v5878_v5 }
 0x4cd PF: > { %s15_s18 = sadd.s32 1, %s6600_s18  }
 0x4ce   : > { %p12_p4 = scmp.ge.s32.totalorder %s15_s18, 4  }
 0x4d0   :  { %14 = sbr.rel (!%p12_p4) target bundleno = 1 (0x1), region = 70 }

</bundles_post_ra>
